<compile_context>
chip_gen: v7x
topology: tpu7x:2x2x1
jax: 0.10.0
libtpu: 0.0.40
codegen_flags: <defaults>
</compile_context>

<pallas_src>
import functools

import jax
import jax.numpy as jnp
from jax.experimental import pallas as pl
from jax.experimental.pallas import tpu as pltpu

EPS = 1e-5
COMPUTE_DTYPE = jnp.bfloat16
_PAD_COL0 = 8   # interior column offset in the conv2 pad scratch (sublane-aligned)


def _vmem_limit_bytes():
    """Per-generation scoped-VMEM budget: ~3/4 of physical, capped at 64 MiB."""
    try:
        phys = getattr(pltpu.get_tpu_info(), "vmem_capacity_bytes", None)
    except Exception:
        phys = None
    if not phys:
        return 32 * 1024 * 1024                      # conservative fallback
    return int(min(64 * 1024 * 1024, (phys * 3) // 4))  # 64MiB v5e/v6e, 48MiB v7x


def _conv3x3_kw_grouped(xpad, w3, H, W, C, col0):
    """3x3 conv as three kw-grouped im2col matmuls (K = 3*C each).

    xpad: (H+2, Wa, C) bf16 value, spatially zero-padded; kw=0 window starts
          at column `col0`.
    w3  : (3, 3*C, C) bf16; w3[kw] rows ordered (kh, cin).
    Returns (H*W, C) f32 accumulator.
    """
    acc = None
    for kw in range(3):
        # TODO(synk): the kw=+-1 column shifts could run on the XLU slot via
        # pltpu.roll instead of a sublane-offset slice copy.
        xs = xpad[:, col0 + kw:col0 + kw + W, :]                  # (H+2, W, C)
        patch = jnp.concatenate(
            [xs[kh:kh + H].reshape(H * W, C) for kh in range(3)], axis=-1)
        part = jnp.dot(patch, w3[kw], preferred_element_type=jnp.float32)
        acc = part if acc is None else acc + part
    return acc                                                    # (H*W, C) f32


def _partial_stats(acc):
    """(sum, sum-of-squares) over rows, taken once from the live f32 acc."""
    s = jnp.sum(acc, axis=0, keepdims=True)
    ss = jnp.sum(acc * acc, axis=0, keepdims=True)
    return jnp.concatenate([s, ss], axis=0)                       # (2, C) f32


def _conv1_kernel(xp_ref, w_ref, y_ref, stats_ref, *, H, W, C):
    """conv1 on one (pre-padded) image + BN1 partial statistics."""
    acc = _conv3x3_kw_grouped(xp_ref[0], w_ref[...], H, W, C, col0=0)
    y_ref[0] = acc.astype(y_ref.dtype)          # stored flat (H*W, C): no reshape
    stats_ref[0] = _partial_stats(acc)


def _conv2_kernel(y1_ref, scale_ref, shift_ref, w_ref, y2_ref, stats_ref,
                  pad_ref, *, H, W, C):
    """bn1(affine) -> relu -> conv2 on one image + BN2 partial statistics."""
    a = y1_ref[0].astype(jnp.float32) * scale_ref[...] + shift_ref[...]
    a = jnp.maximum(a, 0.0).astype(pad_ref.dtype)                 # (H*W, C) bf16

    c0 = _PAD_COL0
    wa = pad_ref.shape[1]
    # Zero only the 1-wide spatial border.  Re-done every step on purpose:
    # under megacore sharding of the "parallel" N axis, not every core sees
    # program_id(0) == 0, so a one-shot pl.when guard would leave garbage
    # borders on the second TensorCore.
    pad_ref[0:1, :, :] = jnp.zeros((1, wa, C), pad_ref.dtype)
    pad_ref[H + 1:H + 2, :, :] = jnp.zeros((1, wa, C), pad_ref.dtype)
    pad_ref[1:H + 1, c0 - 1:c0, :] = jnp.zeros((H, 1, C), pad_ref.dtype)
    pad_ref[1:H + 1, c0 + W:c0 + W + 1, :] = jnp.zeros((H, 1, C), pad_ref.dtype)
    # Interior starts at sublane offset 8 -> unmasked aligned store.
    pad_ref[1:H + 1, c0:c0 + W, :] = a.reshape(H, W, C)

    acc = _conv3x3_kw_grouped(pad_ref[...], w_ref[...], H, W, C, col0=c0 - 1)
    y2_ref[0] = acc.astype(y2_ref.dtype)
    stats_ref[0] = _partial_stats(acc)


def _finalize_kernel(y2_ref, scale_ref, shift_ref, x_ref, out_ref, *, C):
    """bn2(affine) + identity residual + relu for one image (flat layout)."""
    bn = y2_ref[0].astype(jnp.float32) * scale_ref[...] + shift_ref[...]
    # Residual from the ORIGINAL f32 x (not the bf16 padded copy); only the C
    # real channels are written back (padded lanes dropped in-kernel).
    out_ref[0] = jnp.maximum(bn[:, :C] + x_ref[0], 0.0)


def basic_block(x_nchw, w1, g1, b1, w2, g2, b2):
    """x_nchw: (N, C, H, W); w*: (C, C, 3, 3); g*, b*: (C,). Returns NCHW f32."""
    N, Cin, H, W = x_nchw.shape
    Cout = w1.shape[0]
    assert Cin == Cout, "identity shortcut requires in_channels == out_channels"
    C = Cout
    Cp = ((C + 127) // 128) * 128
    # TODO(synk): for C < 128 (stage-1 ResNet widths) zero-padding channels to
    # 128 lanes inflates MXU FLOPs by (Cp/C)^2 and HBM traffic by Cp/C; pack
    # two spatial columns per lane group ((N,H,W/2,2C)) instead.  The padding
    # path here is only efficient when C is already a multiple of 128.
    HW = H * W

    # NCHW -> NHWC once; spatial+channel pad + bf16 cast fused for conv1 input.
    x_nhwc = jnp.transpose(x_nchw, (0, 2, 3, 1))                  # (N,H,W,C) f32
    xpad = jnp.pad(x_nhwc, ((0, 0), (1, 1), (1, 1), (0, Cp - C))
                   ).astype(COMPUTE_DTYPE)
    x_flat = x_nhwc.reshape(N, HW, C)                             # f32 residual
    # TODO(synk): in a full ResNet keep activations NHWC between blocks so the
    # NCHW<->NHWC boundary transposes disappear entirely.

    def prep_w(w):
        # (Cout, Cin, kh, kw) -> (kw, kh, Cin, Cout), pad channels, flatten to
        # (3, 3*Cp, Cp) so w[kw] pairs with the kw-grouped im2col patches.
        wt = jnp.transpose(w, (3, 2, 1, 0))
        wt = jnp.pad(wt, ((0, 0), (0, 0), (0, Cp - C), (0, Cp - C)))
        return wt.reshape(3, 3 * Cp, Cp).astype(COMPUTE_DTYPE)

    w1m, w2m = prep_w(w1), prep_w(w2)

    count = jnp.float32(N * HW)

    def bn_fold(stats, g, b):
        # stats: (N, 2, Cp) per-image partial (sum, sumsq) from the f32 acc.
        # TODO(synk): E[x^2]-E[x]^2 can cancel when |mean| >> std; a centered
        # second pass / Welford accumulation would be safer for real data.
        tot = jnp.sum(stats, axis=0)                              # (2, Cp)
        mean = tot[0] / count
        var = jnp.maximum(tot[1] / count - mean * mean, 0.0)      # clamp: no NaN
        inv = jax.lax.rsqrt(var + EPS)
        gp = jnp.pad(g.astype(jnp.float32), (0, Cp - C))
        bp = jnp.pad(b.astype(jnp.float32), (0, Cp - C))
        scale = gp * inv
        shift = bp - mean * scale
        return scale.reshape(1, Cp), shift.reshape(1, Cp)

    cparams = pltpu.CompilerParams(
        dimension_semantics=("parallel",),        # shard images across TCs
        vmem_limit_bytes=_vmem_limit_bytes(),
    )
    # TODO(synk): for real ResNet shapes (56x56, ...) add an H-tile grid axis
    # (grid=(N, cdiv(H, TH)) with a 2-row halo) so per-step VMEM shrinks and
    # the pipeline gets many more steps; the per-(n, tile) BN partials then
    # sum in bn_fold exactly as the per-image partials do now.

    img_pad_spec = pl.BlockSpec((1, H + 2, W + 2, Cp), lambda n: (n, 0, 0, 0))
    flat_spec = pl.BlockSpec((1, HW, Cp), lambda n: (n, 0, 0))
    # Constant index_map -> weights fetched once, VMEM-resident across steps.
    # TODO(synk): pipeline_mode=pl.Buffered(1) would drop the dead second
    # weight buffer (matters for C=512 under v7x's 64 MiB VMEM).
    w_spec = pl.BlockSpec((3, 3 * Cp, Cp), lambda n: (0, 0, 0))
    vec_spec = pl.BlockSpec((1, Cp), lambda n: (0, 0))
    stats_spec = pl.BlockSpec((1, 2, Cp), lambda n: (n, 0, 0))
    res_spec = pl.BlockSpec((1, HW, C), lambda n: (n, 0, 0))

    y1, st1 = pl.pallas_call(
        functools.partial(_conv1_kernel, H=H, W=W, C=Cp),
        grid=(N,),
        in_specs=[img_pad_spec, w_spec],
        out_specs=(flat_spec, stats_spec),
        out_shape=(jax.ShapeDtypeStruct((N, HW, Cp), COMPUTE_DTYPE),
                   jax.ShapeDtypeStruct((N, 2, Cp), jnp.float32)),
        compiler_params=cparams,
    )(xpad, w1m)

    scale1, shift1 = bn_fold(st1, g1, b1)

    wa = ((_PAD_COL0 + W + 1 + 7) // 8) * 8       # sublane-aligned scratch width
    y2, st2 = pl.pallas_call(
        functools.partial(_conv2_kernel, H=H, W=W, C=Cp),
        grid=(N,),
        in_specs=[flat_spec, vec_spec, vec_spec, w_spec],
        out_specs=(flat_spec, stats_spec),
        out_shape=(jax.ShapeDtypeStruct((N, HW, Cp), COMPUTE_DTYPE),
                   jax.ShapeDtypeStruct((N, 2, Cp), jnp.float32)),
        scratch_shapes=[pltpu.VMEM((H + 2, wa, Cp), COMPUTE_DTYPE)],
        compiler_params=cparams,
    )(y1, scale1, shift1, w2m)

    scale2, shift2 = bn_fold(st2, g2, b2)

    out_flat = pl.pallas_call(
        functools.partial(_finalize_kernel, C=C),
        grid=(N,),
        in_specs=[flat_spec, vec_spec, vec_spec, res_spec],
        out_specs=res_spec,
        out_shape=jax.ShapeDtypeStruct((N, HW, C), jnp.float32),
        compiler_params=cparams,
    )(y2, scale2, shift2, x_flat)

    # flat NHWC -> NCHW (no channel padding to strip: kernel wrote only C).
    return jnp.transpose(out_flat.reshape(N, H, W, C), (0, 3, 1, 2))


def reference(x, w1, g1, b1, w2, g2, b2):
    """Pure-JAX f32 NCHW reference matching the PyTorch forward (training BN)."""
    def conv(x, w):
        return jax.lax.conv_general_dilated(
            x, w, window_strides=(1, 1), padding=((1, 1), (1, 1)),
            dimension_numbers=("NCHW", "OIHW", "NCHW"),
            precision=jax.lax.Precision.HIGHEST)

    def bn(x, g, b):
        mean = jnp.mean(x, axis=(0, 2, 3), keepdims=True)
        var = jnp.mean((x - mean) ** 2, axis=(0, 2, 3), keepdims=True)
        return ((x - mean) / jnp.sqrt(var + EPS)) * g.reshape(1, -1, 1, 1) \
            + b.reshape(1, -1, 1, 1)

    out = jax.nn.relu(bn(conv(x, w1), g1, b1))
    out = bn(conv(out, w2), g2, b2)
    return jax.nn.relu(out + x)


if __name__ == "__main__":
    N, C, H, W = 2, 4, 16, 16
    key = jax.random.PRNGKey(0)
    k = jax.random.split(key, 3)

    x = jax.random.normal(k[0], (N, C, H, W), jnp.float32)
    # conv weights: deterministic random; BN params: PyTorch defaults (1, 0)
    w1 = jax.random.normal(k[1], (C, C, 3, 3), jnp.float32) * 0.2
    w2 = jax.random.normal(k[2], (C, C, 3, 3), jnp.float32) * 0.2
    g1 = jnp.ones((C,), jnp.float32)
    b1 = jnp.zeros((C,), jnp.float32)
    g2 = jnp.ones((C,), jnp.float32)
    b2 = jnp.zeros((C,), jnp.float32)

    out = basic_block(x, w1, g1, b1, w2, g2, b2)
    out = jax.block_until_ready(out)

    ref = reference(x, w1, g1, b1, w2, g2, b2)
    err = float(jnp.max(jnp.abs(out - ref)))
    # bf16 MXU operands with f32 accumulation: expect ~1e-2-level absolute
    # agreement for a two-conv block (BN keeps activations O(1)).
    tol = 5e-2 + 2e-2 * float(jnp.max(jnp.abs(ref)))
    assert err < tol, f"max abs err {err} (tol {tol})"
    print("KERNEL_OK")
</pallas_src>

<mosaic_0001>
module attributes {stable_mosaic.version = 11 : i64} {
  func.func @_conv1_kernel(%arg0: i32, %arg1: memref<1x18x18x128xbf16, #tpu.memory_space<vmem>>, %arg2: memref<3x384x128xbf16, #tpu.memory_space<vmem>>, %arg3: memref<1x256x128xbf16, #tpu.memory_space<vmem>>, %arg4: memref<1x2x128xf32, #tpu.memory_space<vmem>>) attributes {dimension_semantics = [#tpu.dimension_semantics<parallel>], iteration_bounds = array<i64: 2>, scalar_prefetch = 0 : i64, scratch_operands = 0 : i64, tpu.core_type = #tpu.core_type<tc>, window_params = [{transform_indices = @transform_0, window_bounds = array<i64: 1, 18, 18, 128>}, {pipeline_mode = #tpu.pipeline_mode<synchronous>, transform_indices = @transform_1, window_bounds = array<i64: 3, 384, 128>}, {transform_indices = @transform_2, window_bounds = array<i64: 1, 256, 128>}, {transform_indices = @transform_3, window_bounds = array<i64: 1, 2, 128>}]} {
    %c0 = arith.constant 0 : index
    %c0_0 = arith.constant 0 : index
    %c0_1 = arith.constant 0 : index
    %c0_2 = arith.constant 0 : index
    %0 = vector.load %arg1[%c0, %c0_0, %c0_1, %c0_2] : memref<1x18x18x128xbf16, #tpu.memory_space<vmem>>, vector<1x18x18x128xbf16>
    %1 = vector.shape_cast %0 : vector<1x18x18x128xbf16> to vector<18x18x128xbf16>
    %c0_3 = arith.constant 0 : index
    %c0_4 = arith.constant 0 : index
    %c0_5 = arith.constant 0 : index
    %2 = vector.load %arg2[%c0_3, %c0_4, %c0_5] : memref<3x384x128xbf16, #tpu.memory_space<vmem>>, vector<3x384x128xbf16>
    %3 = vector.extract_strided_slice %1 {offsets = [0, 0, 0], sizes = [18, 16, 128], strides = [1, 1, 1]} : vector<18x18x128xbf16> to vector<18x16x128xbf16>
    %4 = vector.extract_strided_slice %3 {offsets = [0, 0, 0], sizes = [16, 16, 128], strides = [1, 1, 1]} : vector<18x16x128xbf16> to vector<16x16x128xbf16>
    %5 = vector.shape_cast %4 : vector<16x16x128xbf16> to vector<256x128xbf16>
    %6 = vector.extract_strided_slice %3 {offsets = [1, 0, 0], sizes = [16, 16, 128], strides = [1, 1, 1]} : vector<18x16x128xbf16> to vector<16x16x128xbf16>
    %7 = vector.shape_cast %6 : vector<16x16x128xbf16> to vector<256x128xbf16>
    %8 = vector.extract_strided_slice %3 {offsets = [2, 0, 0], sizes = [16, 16, 128], strides = [1, 1, 1]} : vector<18x16x128xbf16> to vector<16x16x128xbf16>
    %9 = vector.shape_cast %8 : vector<16x16x128xbf16> to vector<256x128xbf16>
    %10 = tpu.concatenate %5, %7, %9 in 1 : vector<256x128xbf16>, vector<256x128xbf16>, vector<256x128xbf16> -> vector<256x384xbf16>
    %11 = vector.extract_strided_slice %2 {offsets = [0, 0, 0], sizes = [1, 384, 128], strides = [1, 1, 1]} : vector<3x384x128xbf16> to vector<1x384x128xbf16>
    %12 = vector.shape_cast %11 : vector<1x384x128xbf16> to vector<384x128xbf16>
    %cst = arith.constant dense<0.000000e+00> : vector<256x128xf32>
    %13 = tpu.matmul %10, %12, %cst {dimension_numbers = #tpu.dot_dimension_numbers<[1], [0], [0], [1], [0, 0, 1, 1], [], []>} : vector<256x384xbf16>, vector<384x128xbf16>, vector<256x128xf32> -> vector<256x128xf32>
    %14 = vector.extract_strided_slice %1 {offsets = [0, 1, 0], sizes = [18, 16, 128], strides = [1, 1, 1]} : vector<18x18x128xbf16> to vector<18x16x128xbf16>
    %15 = vector.extract_strided_slice %14 {offsets = [0, 0, 0], sizes = [16, 16, 128], strides = [1, 1, 1]} : vector<18x16x128xbf16> to vector<16x16x128xbf16>
    %16 = vector.shape_cast %15 : vector<16x16x128xbf16> to vector<256x128xbf16>
    %17 = vector.extract_strided_slice %14 {offsets = [1, 0, 0], sizes = [16, 16, 128], strides = [1, 1, 1]} : vector<18x16x128xbf16> to vector<16x16x128xbf16>
    %18 = vector.shape_cast %17 : vector<16x16x128xbf16> to vector<256x128xbf16>
    %19 = vector.extract_strided_slice %14 {offsets = [2, 0, 0], sizes = [16, 16, 128], strides = [1, 1, 1]} : vector<18x16x128xbf16> to vector<16x16x128xbf16>
    %20 = vector.shape_cast %19 : vector<16x16x128xbf16> to vector<256x128xbf16>
    %21 = tpu.concatenate %16, %18, %20 in 1 : vector<256x128xbf16>, vector<256x128xbf16>, vector<256x128xbf16> -> vector<256x384xbf16>
    %22 = vector.extract_strided_slice %2 {offsets = [1, 0, 0], sizes = [1, 384, 128], strides = [1, 1, 1]} : vector<3x384x128xbf16> to vector<1x384x128xbf16>
    %23 = vector.shape_cast %22 : vector<1x384x128xbf16> to vector<384x128xbf16>
    %cst_6 = arith.constant dense<0.000000e+00> : vector<256x128xf32>
    %24 = tpu.matmul %21, %23, %cst_6 {dimension_numbers = #tpu.dot_dimension_numbers<[1], [0], [0], [1], [0, 0, 1, 1], [], []>} : vector<256x384xbf16>, vector<384x128xbf16>, vector<256x128xf32> -> vector<256x128xf32>
    %25 = arith.addf %13, %24 : vector<256x128xf32>
    %26 = vector.extract_strided_slice %1 {offsets = [0, 2, 0], sizes = [18, 16, 128], strides = [1, 1, 1]} : vector<18x18x128xbf16> to vector<18x16x128xbf16>
    %27 = vector.extract_strided_slice %26 {offsets = [0, 0, 0], sizes = [16, 16, 128], strides = [1, 1, 1]} : vector<18x16x128xbf16> to vector<16x16x128xbf16>
    %28 = vector.shape_cast %27 : vector<16x16x128xbf16> to vector<256x128xbf16>
    %29 = vector.extract_strided_slice %26 {offsets = [1, 0, 0], sizes = [16, 16, 128], strides = [1, 1, 1]} : vector<18x16x128xbf16> to vector<16x16x128xbf16>
    %30 = vector.shape_cast %29 : vector<16x16x128xbf16> to vector<256x128xbf16>
    %31 = vector.extract_strided_slice %26 {offsets = [2, 0, 0], sizes = [16, 16, 128], strides = [1, 1, 1]} : vector<18x16x128xbf16> to vector<16x16x128xbf16>
    %32 = vector.shape_cast %31 : vector<16x16x128xbf16> to vector<256x128xbf16>
    %33 = tpu.concatenate %28, %30, %32 in 1 : vector<256x128xbf16>, vector<256x128xbf16>, vector<256x128xbf16> -> vector<256x384xbf16>
    %34 = vector.extract_strided_slice %2 {offsets = [2, 0, 0], sizes = [1, 384, 128], strides = [1, 1, 1]} : vector<3x384x128xbf16> to vector<1x384x128xbf16>
    %35 = vector.shape_cast %34 : vector<1x384x128xbf16> to vector<384x128xbf16>
    %cst_7 = arith.constant dense<0.000000e+00> : vector<256x128xf32>
    %36 = tpu.matmul %33, %35, %cst_7 {dimension_numbers = #tpu.dot_dimension_numbers<[1], [0], [0], [1], [0, 0, 1, 1], [], []>} : vector<256x384xbf16>, vector<384x128xbf16>, vector<256x128xf32> -> vector<256x128xf32>
    %37 = arith.addf %25, %36 : vector<256x128xf32>
    %38 = arith.truncf %37 : vector<256x128xf32> to vector<256x128xbf16>
    %c0_8 = arith.constant 0 : index
    %c0_9 = arith.constant 0 : index
    %c0_10 = arith.constant 0 : index
    %39 = vector.load %arg3[%c0_8, %c0_9, %c0_10] : memref<1x256x128xbf16, #tpu.memory_space<vmem>>, vector<1x256x128xbf16>
    %40 = vector.shape_cast %39 : vector<1x256x128xbf16> to vector<256x128xbf16>
    %41 = vector.shape_cast %38 : vector<256x128xbf16> to vector<1x256x128xbf16>
    tpu.vector_store %arg3[%c0_8, %c0_9, %c0_10], %41 {strides = array<i32>} : memref<1x256x128xbf16, #tpu.memory_space<vmem>>, vector<1x256x128xbf16>,
    %cst_11 = arith.constant dense<0.000000e+00> : vector<128xf32>
    %42 = vector.multi_reduction <add>, %37, %cst_11 [0] : vector<256x128xf32> to vector<128xf32>
    %43 = vector.shape_cast %42 : vector<128xf32> to vector<1x128xf32>
    %44 = arith.mulf %37, %37 : vector<256x128xf32>
    %cst_12 = arith.constant dense<0.000000e+00> : vector<128xf32>
    %45 = vector.multi_reduction <add>, %44, %cst_12 [0] : vector<256x128xf32> to vector<128xf32>
    %46 = vector.shape_cast %45 : vector<128xf32> to vector<1x128xf32>
    %47 = tpu.concatenate %43, %46 in 0 : vector<1x128xf32>, vector<1x128xf32> -> vector<2x128xf32>
    %c0_13 = arith.constant 0 : index
    %c0_14 = arith.constant 0 : index
    %c0_15 = arith.constant 0 : index
    %48 = vector.load %arg4[%c0_13, %c0_14, %c0_15] : memref<1x2x128xf32, #tpu.memory_space<vmem>>, vector<1x2x128xf32>
    %49 = vector.shape_cast %48 : vector<1x2x128xf32> to vector<2x128xf32>
    %50 = vector.shape_cast %47 : vector<2x128xf32> to vector<1x2x128xf32>
    tpu.vector_store %arg4[%c0_13, %c0_14, %c0_15], %50 {strides = array<i32>} : memref<1x2x128xf32, #tpu.memory_space<vmem>>, vector<1x2x128xf32>,
    return
  }
  func.func @transform_0(%arg0: i32) -> (i32, i32, i32, i32) {
    %c0_i32 = arith.constant 0 : i32
    %c0_i32_0 = arith.constant 0 : i32
    %c0_i32_1 = arith.constant 0 : i32
    %c0_i32_2 = arith.constant 0 : i32
    return %arg0, %c0_i32, %c0_i32_0, %c0_i32_1 : i32, i32, i32, i32
  }
  func.func @transform_1(%arg0: i32) -> (i32, i32, i32) {
    %c0_i32 = arith.constant 0 : i32
    %c0_i32_0 = arith.constant 0 : i32
    %c0_i32_1 = arith.constant 0 : i32
    %c0_i32_2 = arith.constant 0 : i32
    return %c0_i32, %c0_i32_0, %c0_i32_1 : i32, i32, i32
  }
  func.func @transform_2(%arg0: i32) -> (i32, i32, i32) {
    %c0_i32 = arith.constant 0 : i32
    %c0_i32_0 = arith.constant 0 : i32
    %c0_i32_1 = arith.constant 0 : i32
    return %arg0, %c0_i32, %c0_i32_0 : i32, i32, i32
  }
  func.func @transform_3(%arg0: i32) -> (i32, i32, i32) {
    %c0_i32 = arith.constant 0 : i32
    %c0_i32_0 = arith.constant 0 : i32
    %c0_i32_1 = arith.constant 0 : i32
    return %arg0, %c0_i32, %c0_i32_0 : i32, i32, i32
  }
}

</mosaic_0001>

<bundles_post_ra>
// kernel: tpu_custom_call.1
= control target key start
LH: loop header
LB: loop body
LE: loop exit
PB: predicated region body
PF: predicated region fallthrough
CT: control target
= control target key end

     0   :  { %9 = vsyncpa [#allocation3], 0  ;;  %s5750_s0 = inlined_call_operand.vmem [shape: bf16[2,18,18,128], index: 0, kind: input, shape index: {}]   ;;  %s5751_s1 = inlined_call_operand.vmem [shape: bf16[3,384,128], index: 1, kind: input, shape index: {}]   ;;  %s5752_s2 = inlined_call_operand.hbm [shape: bf16[2,256,128], index: 2, kind: output, shape index: {0}]   ;;  %s5753_s3 = inlined_call_operand.hbm [shape: f32[2,2,128], index: 3, kind: output, shape index: {1}]  }
   0x1   :  { %11 = vsyncpa [#allocation3 + $0x1], 0 }
   0x2   :  { %12 = vsyncpa [#allocation5], 0 }
   0x3   :  { %14 = vsyncpa [#allocation5 + $0x1], 0  ;;  %s4374_s12 = smov 0   ;;  %s4376_s13 = smov 0  }
   0x4   :  { %s4378_s14 = smov 0   ;;  %s4380_s15 = smov 0  }
   0x5 LB: > { %s4395_s16 = sadd.s32 4294967295, %s4348_s15   ;;  %s3038_s17 = sadd.s32 4294967294, %s4348_s15   ;;  %s4348_s15 = sphi %s4380_s15, %s5777_s15   ;;  %s4344_s14 = sphi %s4378_s14, %s5776_s14   ;;  %s4340_s13 = sphi %s4376_s13, %s5775_s13   ;;  %s4336_s12 = sphi %s4374_s12, %s5774_s12  }
   0x6   : > { %s4399_s18 = sadd.s32 1, %s4348_s15   ;;  %s74_s19 = sadd.s32 1, %s4344_s14 }
   0x7   : > { %s71_s20 = ssub.s32 %s4348_s15, %s4399_s18  ;;  %p84_p0 = scmp.ne.s32.totalorder %s4344_s14, %s4340_s13 }
   0x8   : > { %p72_p1 = scmp.eq.s32.totalorder %s71_s20, 0  ;;  %p85_p2 = scmp.eq.s32.totalorder %s4395_s16, 1 }
   0x9   : > { %p90_p3 = scmp.ne.s32.totalorder %s4340_s13, %s4336_s12  ;;  %p91_p4 = scmp.eq.s32.totalorder %s3038_s17, 1 }
   0xa   : > { %s4410_s21 = scalar_select %p72_p1, %s4344_s14, %s74_s19  }
   0xb   : > { %p4412_p5 = por %p85_p2, %p84_p0  ;;  %p4416_p6 = por %p91_p4, %p90_p3 }
   0xc   : > { %p3041_p7 = scmp.ge.s32.totalorder %s4348_s15, 1  ;;  %p146_p8 = scmp.lt.s32.totalorder %s4348_s15, 3 }
   0xe   : > { %p147_p9 = pnand %p3041_p7, %p146_p8 }
  0x10   : > { %150 = sbr.rel (%p147_p9) target bundleno = 616 (0x268), region = 28 }
  0x17   : > { %v4131_v0 = vld [vmem:[%s5751_s1 + $0x100] sm:$0xff]   ;;  %v4134_v3 = vld [vmem:[%s5751_s1 + $0x108] sm:$0xff]   ;;  %v4137_v6 = vld [vmem:[%s5751_s1 + $0x110] sm:$0xff]   ;;  %p175_p10 = scmp.lt.s32.totalorder %s4395_s16, 1  ;;  %vm487_vm0 = vsmask.f32 3328 }
  0x18   : > { %v4428_v1 = vld [vmem:[%s5751_s1 + $0x140] sm:$0xff]   ;;  %3356 = vmatprep.subr.bf16.mxu0 %v4131_v0  ;;  %v4441_v4 = vld [vmem:[%s5751_s1 + $0x148] sm:$0xff]   ;;  %v4453_v7 = vld [vmem:[%s5751_s1 + $0x150] sm:$0xff]   ;;  %vm488_vm1 = vsmask.f32 7440  ;;  %vm1942_vm3 = vcmask 1042432  }
  0x19   : > { %v4133_v2 = vld [vmem:[%s5751_s1 + $0xc0] sm:$0xff]   ;;  %3908 = vmatprep.subr.bf16.mxu1 %v4428_v1  ;;  %v4136_v5 = vld [vmem:[%s5751_s1 + $0xc8] sm:$0xff]   ;;  %v4139_v8 = vld [vmem:[%s5751_s1 + $0xd0] sm:$0xff]   ;;  %s176_s7 = scalar_select %p175_p10, %s4395_s16, 1  ;;  %vm1943_vm4 = vcmask 1046532  }
  0x1a   : > { %3357 = vmatpush3.bf16.msra.mxu0 %v4133_v2  ;;  %3916 = vmatpush3.bf16.msra.mxu1 %v4428_v1  ;;  %v4140_v9 = vld [vmem:[%s5751_s1 + $0x118] sm:$0xff]   ;;  %v4143_v12 = vld [vmem:[%s5751_s1 + $0x120] sm:$0xff]   ;;  %v4146_v15 = vld [vmem:[%s5751_s1 + $0x128] sm:$0xff]   ;;  %s3260_s10 = sshll.u32 %s4395_s16, 11  ;;  %s4350_s26 = smov [#allocation2]  }
  0x1b   : > { %3358 = vmatprep.subr.bf16.mxu0 %v4134_v3  ;;  %3909 = vmatprep.subr.bf16.mxu1 %v4441_v4  ;;  %v4467_v10 = vld [vmem:[%s5751_s1 + $0x158] sm:$0xff]   ;;  %v4480_v13 = vld [vmem:[%s5751_s1 + $0x160] sm:$0xff]   ;;  %v4494_v16 = vld [vmem:[%s5751_s1 + $0x168] sm:$0xff]   ;;  %s4084_s20 = smul.u32 216, %s176_s7  ;;  %s4258_s27 = sshll.u32 %s4350_s26, 4  ;;  %s4259_s27 = int_to_ptr.vmem [resolvable:$false] %s4258_s27 }
  0x1c   : > { %v4142_v11 = vld [vmem:[%s5751_s1 + $0xd8] sm:$0xff]   ;;  %v4145_v14 = vld [vmem:[%s5751_s1 + $0xe0] sm:$0xff]   ;;  %v4148_v17 = vld [vmem:[%s5751_s1 + $0xe8] sm:$0xff]   ;;  %s4260_s28 = scalar_lea.vmem %s4259_s27, 4096 }
  0x1d   : > { %v4149_v18 = vld [vmem:[%s5751_s1 + $0x130] sm:$0xff]   ;;  %s4512_s5 = scalar_lea.vmem %s5750_s0, %s4084_s20  ;;  %v4152_v21 = vld [vmem:[%s5751_s1 + $0x138] sm:$0xff]   ;;  %v4155_v46 = vld [vmem:[%s5751_s1 + $0x40] sm:$0xff]   ;;  %s5672_s20 = scalar_lea.hbm %s5752_s2, %s3260_s10 }
  0x1e   : > { %3359 = vmatpush3.bf16.msra.mxu0 %v4136_v5  ;;  %3917 = vmatpush3.bf16.msra.mxu1 %v4441_v4  ;;  %v4507_v19 = vld [vmem:[%s5751_s1 + $0x170] sm:$0xff]   ;;  %v4523_v22 = vld [vmem:[%s5751_s1 + $0x178] sm:$0xff]   ;;  %v4527_v23 = vld [vmem:[%s4512_s5 + $0xc] sm:$0xf] }
  0x1f   : > { %3360 = vmatprep.subr.bf16.mxu0 %v4137_v6  ;;  %3910 = vmatprep.subr.bf16.mxu1 %v4453_v7  ;;  %v4151_v20 = vld [vmem:[%s5751_s1 + $0xf0] sm:$0xff]   ;;  %v515_v26 = vshrl.u32 %v4527_v23, 16  ;;  %v518_v27 = vshll.u32 %v4527_v23, 16  ;;  %v4154_v28 = vld [vmem:[%s5751_s1 + $0xf8] sm:$0xff]   ;;  %v213_v36 = vld [vmem:[%s4512_s5 + $0x80] sm:$0x1] }
  0x20   : > { %v4530_v24 = vld [vmem:[%s4512_s5 + $0x10] sm:$0xf]  ;;  %v186_v25 = vld [vmem:[%s4512_s5 + $0x14] sm:$0x1]  ;;  %v211_v32 = vld [vmem:[%s4512_s5 + $0x78] sm:$0xf] }
  0x21   : > { %v524_v29 = vshll.u32 %v4530_v24, 16  ;;  %v528_v30 = vshrl.u32 %v4530_v24, 16  ;;  %v534_v31 = vshll.u32 %v186_v25, 16  ;;  %v517_v33 = vrot.slane %v515_v26, 4  ;;  %v212_v35 = vld [vmem:[%s4512_s5 + $0x7c] sm:$0xf]  ;;  %vm4554_vm2 = vmor %vm487_vm0, %vm488_vm1 }
  0x22   : > { %3361 = vmatpush3.bf16.msra.mxu0 %v4139_v8  ;;  %3918 = vmatpush3.bf16.msra.mxu1 %v4453_v7  ;;  %v520_v34 = vrot.slane %v518_v27, 5  ;;  %v731_v40 = vshrl.u32 %v211_v32, 16  ;;  %v4546_v41 = vld [vmem:[%s4512_s5] sm:$0xf]  ;;  %v734_v43 = vshll.u32 %v211_v32, 16  ;;  %v740_v44 = vshll.u32 %v212_v35, 16  ;;  %vm4979_vm5 = vmor %vm1942_vm3, %vm1943_vm4 }
  0x23   : > { %3362 = vmatprep.subr.bf16.mxu0 %v4140_v9  ;;  %3911 = vmatprep.subr.bf16.mxu1 %v4467_v10  ;;  %v526_v37 = vrot.slane %v524_v29, 5  ;;  %v530_v38 = vrot.slane %v528_v30, 4  ;;  %v536_v39 = vrot.slane %v534_v31, 5  ;;  %v744_v45 = vshrl.u32 %v212_v35, 16  ;;  %v4559_v51 = vld [vmem:[%s4512_s5 + $0x4] sm:$0xf] }
  0x24   : > { %v521_v42 = vor.u32 %v520_v34, %v517_v33  ;;  %v733_v49 = vrot.slane %v731_v40, 4  ;;  %v750_v50 = vshll.u32 %v213_v36, 16  ;;  %v491_v52 = vshrl.u32 %v4546_v41, 16  ;;  %v183_v57 = vld [vmem:[%s4512_s5 + $0x8] sm:$0x1]  ;;  %v4202_v47 = vld [vmem:[%s5751_s1 + $0xb8] sm:$0xff]  }
  0x25   : > { %v531_v48 = vor.u32 %v530_v38, %v526_v37  ;;  %v736_v54 = vrot.slane %v734_v43, 5  ;;  %v742_v55 = vrot.slane %v740_v44, 5  ;;  %v746_v56 = vrot.slane %v744_v45, 4  ;;  %v214_v62 = vld [vmem:[%s4512_s5 + $0x84] sm:$0xf] }
  0x26   : > { %3363 = vmatpush3.bf16.msra.mxu0 %v4142_v11  ;;  %3919 = vmatpush3.bf16.msra.mxu1 %v4467_v10  ;;  %v522_v53 = vrot.slane %v521_v42, 4  ;;  %v752_v59 = vrot.slane %v750_v50, 5  ;;  %v493_v60 = vrot.slane %v491_v52, 4  ;;  %v494_v61 = vshll.u32 %v4546_v41, 16  ;;  %v215_v5 = vld [vmem:[%s4512_s5 + $0x88] sm:$0xf] }
  0x27   : > { %3364 = vmatprep.subr.bf16.mxu0 %v4143_v12  ;;  %3912 = vmatprep.subr.bf16.mxu1 %v4480_v13  ;;  %v532_v58 = vrot.slane %v531_v48, 4  ;;  %v737_v0 = vor.u32 %v736_v54, %v733_v49  ;;  %v747_v2 = vor.u32 %v746_v56, %v742_v55  ;;  %v500_v3 = vshll.u32 %v4559_v51, 16  ;;  %v216_v25 = vld [vmem:[%s4512_s5 + $0x8c] sm:$0x1]  ;;  %v4585_v38 = vld [vmem:[%s4512_s5 + $0x18] sm:$0xf] }
  0x28   : > { %v527_v63 = vsel %vm4554_vm2, %v522_v53, %v526_v37  ;;  %v496_v8 = vrot.slane %v494_v61, 5  ;;  %v504_v9 = vshrl.u32 %v4559_v51, 16  ;;  %v510_v11 = vshll.u32 %v183_v57, 16  ;;  %v4591_v43 = vld [vmem:[%s4512_s5 + $0x1c] sm:$0xf] }
  0x29   : > { %v537_v6 = vsel %vm4554_vm2, %v532_v58, %v536_v39  ;;  %v758_v29 = vshll.u32 %v214_v62, 16  ;;  %v764_v33 = vshll.u32 %v215_v5, 16  ;;  %v768_v36 = vshrl.u32 %v215_v5, 16  ;;  %v189_v49 = vld [vmem:[%s4512_s5 + $0x20] sm:$0x1] }
  0x2a   : > { %3365 = vmatpush3.bf16.msra.mxu0 %v4145_v14  ;;  %3920 = vmatpush3.bf16.msra.mxu1 %v4480_v13  ;;  %v4574_v12 = vcombine.low %v527_v63, %v537_v6  ;;  %v738_v14 = vrot.slane %v737_v0, 4  ;;  %v774_v37 = vshll.u32 %v216_v25, 16  ;;  %v4595_v44 = vcombine.low %v4527_v23, %v4530_v24  ;;  %v217_v56 = vld [vmem:[%s4512_s5 + $0x90] sm:$0xf]  ;;  %v219_v0 = vld [vmem:[%s4512_s5 + $0x98] sm:$0x1] }
  0x2b   : > { %3366 = vmatprep.subr.bf16.mxu0 %v4146_v15  ;;  %3913 = vmatprep.subr.bf16.mxu1 %v4494_v16  ;;  %v748_v15 = vrot.slane %v747_v2, 4  ;;  %v760_v35 = vrot.slane %v758_v29, 5  ;;  %v766_v42 = vrot.slane %v764_v33, 5  ;;  %v539_v50 = vshrl.u32 %v4585_v38, 16  ;;  %v220_v2 = vld [vmem:[%s4512_s5 + $0x9c] sm:$0xf] }
  0x2c   : > { %1170 = vmatprep.mubr.bf16.mxu0 %v4574_v12  ;;  %v743_v26 = vsel %vm4554_vm2, %v738_v14, %v742_v55  ;;  %v776_v48 = vrot.slane %v774_v37, 5  ;;  %v542_v53 = vshll.u32 %v4585_v38, 16  ;;  %v548_v54 = vshll.u32 %v4591_v43, 16  ;;  %v4158_v33 = vld [vmem:[%s5751_s1 + $0x8] sm:$0xff]  }
  0x2d   : > { %v753_v27 = vsel %vm4554_vm2, %v748_v15, %v752_v59  ;;  %v552_v55 = vshrl.u32 %v4591_v43, 16  ;;  %v541_v58 = vrot.slane %v539_v50, 4  ;;  %v218_v59 = vld [vmem:[%s4512_s5 + $0x94] sm:$0xf]  ;;  %v558_v63 = vshll.u32 %v189_v49, 16 }
  0x2e   : > { %3367 = vmatpush3.bf16.msra.mxu0 %v4148_v17  ;;  %3921 = vmatpush3.bf16.msra.mxu1 %v4494_v16  ;;  %v502_v17 = vrot.slane %v500_v3, 5  ;;  %v4582_v30 = vcombine.low %v743_v26, %v753_v27  ;;  %v550_v61 = vrot.slane %v548_v54, 5  ;;  %v779_v6 = vshrl.u32 %v217_v56, 16 }
  0x2f   : > { %3368 = vmatprep.subr.bf16.mxu0 %v4149_v18  ;;  %3914 = vmatprep.subr.bf16.mxu1 %v4507_v19  ;;  %v497_v18 = vor.u32 %v496_v8, %v493_v60  ;;  %v544_v60 = vrot.slane %v542_v53, 5  ;;  %v782_v8 = vshll.u32 %v217_v56, 16  ;;  %v560_v15 = vrot.slane %v558_v63, 5  ;;  %v4639_v53 = vld [vmem:[%s4512_s5 + $0x24] sm:$0xf] }
  0x30   : > { %3796 = vmatprep.mubr.bf16.mxu1 %v4582_v30  ;;  %v792_v26 = vshrl.u32 %v218_v59, 16  ;;  %v803_v37 = vshrl.u32 %v220_v2, 16  ;;  %v566_v63 = vshll.u32 %v4639_v53, 16 }
  0x31   : > { %v498_v31 = vrot.slane %v497_v18, 4  ;;  %v784_v25 = vrot.slane %v782_v8, 5 }
  0x32   : > { %3369 = vmatpush3.bf16.msra.mxu0 %v4151_v20  ;;  %3922 = vmatpush3.bf16.msra.mxu1 %v4507_v19  ;;  %v506_v20 = vrot.slane %v504_v9, 4  ;;  %v221_v9 = vld [vmem:[%s4512_s5 + $0xa0] sm:$0xf]  ;;  %v805_v54 = vrot.slane %v803_v37, 4 }
  0x33   : > { %3370 = vmatprep.subr.bf16.mxu0 %v4152_v21  ;;  %3915 = vmatprep.subr.bf16.mxu1 %v4523_v22  ;;  %v512_v21 = vrot.slane %v510_v11, 5  ;;  %v503_v39 = vsel %vm4554_vm2, %v498_v31, %v502_v17  ;;  %v545_v11 = vor.u32 %v544_v60, %v541_v58  ;;  %v563_v60 = vshrl.u32 %v4639_v53, 16 }
  0x34   : > { %v507_v32 = vor.u32 %v506_v20, %v502_v17  ;;  %v788_v17 = vshll.u32 %v218_v59, 16  ;;  %v4156_v20 = vld [vmem:[%s5751_s1] sm:$0xff]   ;;  %v4649_v59 = vld [vmem:[%s4512_s5 + $0x2c] sm:$0x1] }
  0x35   : > { %v565_v8 = vrot.slane %v563_v60, 4 }
  0x36   : > { %3371 = vmatpush3.bf16.msra.mxu0 %v4154_v28  ;;  %3923 = vmatpush3.bf16.msra.mxu1 %v4523_v22  ;;  %v755_v28 = vshrl.u32 %v214_v62, 16  ;;  %v508_v40 = vrot.slane %v507_v32, 4  ;;  %v554_v62 = vrot.slane %v552_v55, 4  ;;  %v790_v31 = vrot.slane %v788_v17, 5  ;;  %v222_v32 = vld [vmem:[%s4512_s5 + $0xa4] sm:$0x1] }
  0x37   : > { %3764 = vmatprep.subr.bf16.mxu0 %v4428_v1  ;;  %3492 = vmatprep.subr.bf16.mxu1 %v4155_v46  ;;  %v770_v46 = vrot.slane %v768_v36, 4  ;;  %v798_v36 = vshll.u32 %v219_v0, 16  ;;  %v822_v58 = vshll.u32 %v222_v32, 16  ;;  %v568_v17 = vrot.slane %v566_v63, 5 }
  0x38   : > { %v757_v34 = vrot.slane %v755_v28, 4  ;;  %v513_v52 = vsel %vm4554_vm2, %v508_v40, %v512_v21  ;;  %v555_v14 = vor.u32 %v554_v62, %v550_v61  ;;  %v781_v21 = vrot.slane %v779_v6, 4  ;;  %v4160_v6 = vld [vmem:[%s5751_s1 + $0x10] sm:$0xff]  }
  0x39   : > { %v3063_v23 = vcombine.low %v503_v39, %v513_v52  ;;  %v771_v57 = vor.u32 %v770_v46, %v766_v42  ;;  %v546_v28 = vrot.slane %v545_v11, 4  ;;  %v4159_v46 = vld [vmem:[%s5751_s1 + $0x50] sm:$0xff]   ;;  %v800_v52 = vrot.slane %v798_v36, 5 }
  0x3a   : > { %v761_v45 = vor.u32 %v760_v35, %v757_v34  ;;  %v556_v29 = vrot.slane %v555_v14, 4  ;;  %v785_v34 = vor.u32 %v784_v25, %v781_v21  ;;  %v794_v35 = vrot.slane %v792_v26, 4 }
  0x3b   : > { %1171 = vmatmul.mubr.bf16.vlgmr.msra.gmra.mrb[0].mxu0 %v3063_v23  ;;  %v772_v5 = vrot.slane %v771_v57, 4  ;;  %v551_v39 = vsel %vm4554_vm2, %v546_v28, %v550_v61  ;;  %v816_v23 = vshrl.u32 %v221_v9, 16  ;;  %v582_v26 = vshll.u32 %v4649_v59, 16  ;;  %v4678_v28 = vld [vmem:[%s4512_s5 + $0xb4] sm:$0xf] }
  0x3c   : > { %v762_v24 = vrot.slane %v761_v45, 4  ;;  %3765 = vmatpush3.bf16.msra.mxu0 %v4428_v1  ;;  %v4157_v1 = vld [vmem:[%s5751_s1 + $0x48] sm:$0xff]   ;;  %v561_v40 = vsel %vm4554_vm2, %v556_v29, %v560_v15  ;;  %v812_v45 = vshll.u32 %v221_v9, 16  ;;  %v786_v49 = vrot.slane %v785_v34, 4  ;;  %5762 = vst [vmem:[#allocation8_spill] sm:$0xff] %v4678_v28 }
  0x3d   : > { %v777_v18 = vsel %vm4554_vm2, %v772_v5, %v776_v48  ;;  %3766 = vmatprep.subr.bf16.mxu0 %v4441_v4  ;;  %v4636_v48 = vcombine.low %v551_v39, %v561_v40  ;;  %v795_v50 = vor.u32 %v794_v35, %v790_v31  ;;  %v818_v62 = vrot.slane %v816_v23, 4  ;;  %v4162_v40 = vld [vmem:[%s5751_s1 + $0x18] sm:$0xff]  }
  0x3e   : > { %v767_v3 = vsel %vm4554_vm2, %v762_v24, %v766_v42  ;;  %v806_v42 = vshll.u32 %v220_v2, 16  ;;  %v814_v56 = vrot.slane %v812_v45, 5  ;;  %v4643_v24 = vld [vmem:[%s4512_s5 + $0x28] sm:$0xf]  ;;  %v824_v5 = vrot.slane %v822_v58, 5  ;;  %v4164_v58 = vld [vmem:[%s5751_s1 + $0x20] sm:$0xff]  }
  0x3f   : > { %v4618_v27 = vcombine.low %v767_v3, %v777_v18  ;;  %1178 = vmatprep.mubr.bf16.mxu0 %v4636_v48  ;;  %v796_v57 = vrot.slane %v795_v50, 4  ;;  %v572_v0 = vshll.u32 %v4643_v24, 16  ;;  %v4656_v2 = vld [vmem:[%s4512_s5 + $0xa8] sm:$0xf]  ;;  %v576_v9 = vshrl.u32 %v4643_v24, 16 }
  0x40   : > { %3767 = vmatpush3.bf16.msra.mxu0 %v4441_v4  ;;  %v808_v55 = vrot.slane %v806_v42, 5  ;;  %v791_v4 = vsel %vm4554_vm2, %v786_v49, %v790_v31  ;;  %v819_v15 = vor.u32 %v818_v62, %v814_v56  ;;  %v4671_v18 = vld [vmem:[%s4512_s5 + $0xac] sm:$0xf]  ;;  %v569_v31 = vor.u32 %v568_v17, %v565_v8  ;;  %v228_v49 = vld [vmem:[%s4512_s5 + $0xbc] sm:$0x1] }
  0x41   : > { %3797 = vmatmul.mubr.bf16.vlgmr.msra.gmra.mrb[0].mxu1 %v4618_v27  ;;  %3768 = vmatprep.subr.bf16.mxu0 %v4453_v7  ;;  %v801_v3 = vsel %vm4554_vm2, %v796_v57, %v800_v52  ;;  %v574_v21 = vrot.slane %v572_v0, 5  ;;  %v578_v25 = vrot.slane %v576_v9, 4  ;;  %v830_v32 = vshll.u32 %v4656_v2, 16  ;;  %v4165_v0 = vld [vmem:[%s5751_s1 + $0x68] sm:$0xff]   ;;  %v4720_v8 = vld [vmem:[%s4512_s5 + $0x30] sm:$0xf] }
  0x42   : > { %3493 = vmatpush3.bf16.msra.mxu1 %v4156_v20  ;;  %v809_v61 = vor.u32 %v808_v55, %v805_v54  ;;  %v4668_v11 = vcombine.low %v791_v4, %v801_v3  ;;  %v225_v20 = vld [vmem:[%s4512_s5 + $0xb0] sm:$0x1]  ;;  %v820_v29 = vrot.slane %v819_v15, 4  ;;  %v584_v35 = vrot.slane %v582_v26, 5  ;;  %v4163_v55 = vld [vmem:[%s5751_s1 + $0x60] sm:$0xff]  }
  0x43   : > { %3494 = vmatprep.subr.bf16.mxu1 %v4157_v1  ;;  %1179 = vmatmul.mubr.bf16.gmra.mrb[4].mxu0 %v4574_v12  ;;  %v4161_v12 = vld [vmem:[%s5751_s1 + $0x58] sm:$0xff]   ;;  %v827_v1 = vshrl.u32 %v4656_v2, 16  ;;  %v579_v34 = vor.u32 %v578_v25, %v574_v21  ;;  %v836_v37 = vshll.u32 %v4671_v18, 16  ;;  %v570_v42 = vrot.slane %v569_v31, 4 }
  0x44   : > { %3769 = vmatpush3.bf16.msra.mxu0 %v4453_v7  ;;  %v810_v14 = vrot.slane %v809_v61, 4  ;;  %3800 = vmatprep.mubr.bf16.mxu1 %v4668_v11  ;;  %v825_v39 = vsel %vm4554_vm2, %v820_v29, %v824_v5  ;;  %v832_v45 = vrot.slane %v830_v32, 5  ;;  %v851_v57 = vshrl.u32 %v4678_v28, 16  ;;  %v4731_v25 = vld [vmem:[%s4512_s5 + $0x38] sm:$0x1] }
  0x45   : > { %3770 = vmatprep.subr.bf16.mxu0 %v4467_v10  ;;  %v829_v36 = vrot.slane %v827_v1, 4  ;;  %v580_v52 = vrot.slane %v579_v34, 4  ;;  %v838_v54 = vrot.slane %v836_v37, 5  ;;  %v854_v62 = vshll.u32 %v4678_v28, 16  ;;  %v4738_v34 = vld [vmem:[%s4512_s5 + $0xc0] sm:$0xf] }
  0x46   : > { %3495 = vmatpush3.bf16.msra.mxu1 %v4158_v33  ;;  %v815_v7 = vsel %vm4554_vm2, %v810_v14, %v814_v56  ;;  %v4685_v33 = vld [vmem:[%s4512_s5 + $0xb8] sm:$0xf]  ;;  %v575_v56 = vsel %vm4554_vm2, %v570_v42, %v574_v21  ;;  %v870_v17 = vshll.u32 %v228_v49, 16  ;;  %v587_v26 = vshrl.u32 %v4720_v8, 16  ;;  %5763 = vst [vmem:[#allocation9_spill] sm:$0xff] %v4738_v34 }
  0x47   : > { %3496 = vmatprep.subr.bf16.mxu1 %v4159_v46  ;;  %v840_v46 = vshrl.u32 %v4671_v18, 16  ;;  %v4697_v50 = vcombine.low %v815_v7, %v825_v39  ;;  %v833_v23 = vor.u32 %v832_v45, %v829_v36  ;;  %v585_v60 = vsel %vm4554_vm2, %v580_v52, %v584_v35  ;;  %v4166_v36 = vld [vmem:[%s5751_s1 + $0x28] sm:$0xff]   ;;  %v4747_v42 = vld [vmem:[%s4512_s5 + $0xc4] sm:$0xf]  ;;  %v4182_v28 = vld [vmem:[%s5751_s1 + $0x98] sm:$0xff]  }
  0x48   : > { %3771 = vmatpush3.bf16.msra.mxu0 %v4467_v10  ;;  %v846_v10 = vshll.u32 %v225_v20, 16  ;;  %v860_v63 = vshll.u32 %v4685_v33, 16  ;;  %v4717_v3 = vcombine.low %v575_v56, %v585_v60  ;;  %v856_v9 = vrot.slane %v854_v62, 5  ;;  %v4725_v20 = vld [vmem:[%s4512_s5 + $0x34] sm:$0xf]  ;;  %5764 = vst [vmem:[#allocation10_spill] sm:$0xff] %v4747_v42 }
  0x49   : > { %3772 = vmatprep.subr.bf16.mxu0 %v4480_v13  ;;  %v842_v4 = vrot.slane %v840_v46, 4  ;;  %3801 = vmatmul.mubr.bf16.gmra.mrb[4].mxu1 %v4697_v50  ;;  %v834_v5 = vrot.slane %v833_v23, 4  ;;  %v864_v15 = vshrl.u32 %v4685_v33, 16  ;;  %v590_v1 = vshll.u32 %v4720_v8, 16  ;;  %v4766_v62 = vld [vmem:[%s4512_s5 + $0xd0] sm:$0xf] }
  0x4a   : > { %3497 = vmatpush3.bf16.msra.mxu1 %v4160_v6  ;;  %v848_v61 = vrot.slane %v846_v10, 5  ;;  %v862_v14 = vrot.slane %v860_v63, 5  ;;  %1186 = vmatprep.mubr.bf16.mxu0 %v4717_v3  ;;  %v872_v31 = vrot.slane %v870_v17, 5  ;;  %v596_v32 = vshll.u32 %v4725_v20, 16  ;;  %v4167_v10 = vld [vmem:[%s5751_s1 + $0x70] sm:$0xff]   ;;  %5765 = vst [vmem:[#allocation11_spill] sm:$0xff] %v4766_v62 }
  0x4b   : > { %3498 = vmatprep.subr.bf16.mxu1 %v4161_v12  ;;  %v843_v6 = vor.u32 %v842_v4, %v838_v54  ;;  %v853_v12 = vrot.slane %v851_v57, 4  ;;  %1187 = vmatmul.mubr.bf16.gmra.mrb[8].mxu0 %v4636_v48  ;;  %v866_v29 = vrot.slane %v864_v15, 4  ;;  %v589_v37 = vrot.slane %v587_v26, 4  ;;  %v232_v4 = vld [vmem:[%s4512_s5 + $0xcc] sm:$0xf]  ;;  %v4168_v63 = vld [vmem:[%s5751_s1 + $0x30] sm:$0xff]  }
  0x4c   : > { %3773 = vmatpush3.bf16.msra.mxu0 %v4480_v13  ;;  %v839_v13 = vsel %vm4554_vm2, %v834_v5, %v838_v54  ;;  %v592_v39 = vrot.slane %v590_v1, 5  ;;  %v598_v52 = vrot.slane %v596_v32, 5  ;;  %v231_v54 = vld [vmem:[%s4512_s5 + $0xc8] sm:$0x1]  ;;  %v606_v23 = vshll.u32 %v4731_v25, 16  ;;  %v4192_v26 = vld [vmem:[%s5751_s1 + $0x1c0] sm:$0xff]  }
  0x4d   : > { %3774 = vmatprep.subr.bf16.mxu0 %v4494_v16  ;;  %v844_v21 = vrot.slane %v843_v6, 4  ;;  %v857_v7 = vor.u32 %v856_v9, %v853_v12  ;;  %v867_v49 = vor.u32 %v866_v29, %v862_v14  ;;  %v878_v60 = vshll.u32 %v4738_v34, 16  ;;  %v4169_v9 = vld [vmem:[%s5751_s1 + $0x78] sm:$0xff]  }
  0x4e   : > { %3499 = vmatpush3.bf16.msra.mxu1 %v4162_v40  ;;  %v600_v40 = vshrl.u32 %v4725_v20, 16  ;;  %v608_v6 = vrot.slane %v606_v23, 5  ;;  %v894_v29 = vshll.u32 %v231_v54, 16 }
  0x4f   : > { %3500 = vmatprep.subr.bf16.mxu1 %v4163_v55  ;;  %v849_v35 = vsel %vm4554_vm2, %v844_v21, %v848_v61  ;;  %v858_v46 = vrot.slane %v857_v7, 4  ;;  %v593_v55 = vor.u32 %v592_v39, %v589_v37  ;;  %v884_v61 = vshll.u32 %v4747_v42, 16  ;;  %v234_v21 = vld [vmem:[%s4512_s5 + $0xd4] sm:$0x1]  ;;  %v4170_v37 = vld [vmem:[%s5751_s1 + $0x38] sm:$0xff]  }
  0x50   : > { %3775 = vmatpush3.bf16.msra.mxu0 %v4494_v16  ;;  %v4750_v45 = vcombine.low %v839_v13, %v849_v35  ;;  %v602_v56 = vrot.slane %v600_v40, 4  ;;  %v875_v16 = vshrl.u32 %v4738_v34, 16  ;;  %v880_v15 = vrot.slane %v878_v60, 5  ;;  %v4915_v34 = vld [vmem:[%s4512_s5 + $0x74] sm:$0x1] }
  0x51   : > { %3776 = vmatprep.subr.bf16.mxu0 %v4507_v19  ;;  %v863_v57 = vsel %vm4554_vm2, %v858_v46, %v862_v14  ;;  %v886_v17 = vrot.slane %v884_v61, 5  ;;  %v888_v13 = vshrl.u32 %v4747_v42, 16  ;;  %v899_v35 = vshrl.u32 %v232_v4, 16  ;;  %v4810_v61 = vld [vmem:[%s4512_s5 + $0x40] sm:$0xf] }
  0x52   : > { %3501 = vmatpush3.bf16.msra.mxu1 %v4164_v58  ;;  %3804 = vmatprep.mubr.bf16.mxu1 %v4750_v45  ;;  %v868_v58 = vrot.slane %v867_v49, 4  ;;  %v603_v5 = vor.u32 %v602_v56, %v598_v52  ;;  %v877_v12 = vrot.slane %v875_v16, 4  ;;  %v896_v40 = vrot.slane %v894_v29, 5 }
  0x53   : > { %3502 = vmatprep.subr.bf16.mxu1 %v4165_v0  ;;  %v594_v0 = vrot.slane %v593_v55, 4  ;;  %v890_v32 = vrot.slane %v888_v13, 4  ;;  %v908_v46 = vshll.u32 %v4766_v62, 16  ;;  %v912_v49 = vshrl.u32 %v4766_v62, 16 }
  0x54   : > { %3777 = vmatpush3.bf16.msra.mxu0 %v4507_v19  ;;  %v873_v14 = vsel %vm4554_vm2, %v868_v58, %v872_v31  ;;  %v604_v7 = vrot.slane %v603_v5, 4  ;;  %v881_v31 = vor.u32 %v880_v15, %v877_v12  ;;  %v901_v56 = vrot.slane %v899_v35, 4  ;;  %v4804_v58 = vld [vmem:[%s4512_s5 + $0x3c] sm:$0xf] }
  0x55   : > { %3778 = vmatprep.subr.bf16.mxu0 %v4523_v22  ;;  %v4783_v1 = vcombine.low %v863_v57, %v873_v14  ;;  %v599_v19 = vsel %vm4554_vm2, %v594_v0, %v598_v52  ;;  %v4798_v52 = vld [vmem:[%s5751_s1 + $0x80] sm:$0xff]   ;;  %v891_v55 = vor.u32 %v890_v32, %v886_v17  ;;  %v910_v16 = vrot.slane %v908_v46, 5 }
  0x56   : > { %3503 = vmatpush3.bf16.msra.mxu1 %v4166_v36  ;;  %v902_v36 = vshll.u32 %v232_v4, 16  ;;  %v609_v39 = vsel %vm4554_vm2, %v604_v7, %v608_v6  ;;  %v914_v4 = vrot.slane %v912_v49, 4  ;;  %v918_v57 = vshll.u32 %v234_v21, 16  ;;  %v4813_v0 = vld [vmem:[%s4512_s5 + $0x44] sm:$0x1] }
  0x57   : > { %3504 = vmatprep.subr.bf16.mxu1 %v4167_v10  ;;  %3805 = vmatmul.mubr.bf16.gmra.mrb[8].mxu1 %v4783_v1  ;;  %v4801_v54 = vcombine.low %v599_v19, %v609_v39  ;;  %v882_v10 = vrot.slane %v881_v31, 4  ;;  %v892_v60 = vrot.slane %v891_v55, 4  ;;  %v3045_v5 = vcombine.low %v4546_v41, %v4559_v51 }
  0x58   : > { %3779 = vmatpush3.bf16.msra.mxu0 %v4523_v22  ;;  %v904_v23 = vrot.slane %v902_v36, 5  ;;  %v915_v12 = vor.u32 %v914_v4, %v910_v16  ;;  %v614_v14 = vshll.u32 %v4804_v58, 16  ;;  %v620_v13 = vshll.u32 %v4810_v61, 16 }
  0x59   : > { %3628 = vmatprep.subr.bf16.mxu0 %v4192_v26  ;;  %1194 = vmatprep.mubr.bf16.mxu0 %v4801_v54  ;;  %v887_v22 = vsel %vm4554_vm2, %v882_v10, %v886_v17  ;;  %v897_v15 = vsel %vm4554_vm2, %v892_v60, %v896_v40  ;;  %v624_v21 = vshrl.u32 %v4810_v61, 16  ;;  %v4825_v26 = vld [vmem:[%s4512_s5 + $0x48] sm:$0xf]  ;;  %v630_v36 = vshll.u32 %v4813_v0, 16  ;;  %v4841_v10 = vld [vmem:[%s4512_s5 + $0x50] sm:$0x1] }
  0x5a   : > { %3505 = vmatpush3.bf16.msra.mxu1 %v4168_v63  ;;  %v611_v63 = vshrl.u32 %v4804_v58, 16  ;;  %1195 = vmatmul.mubr.bf16.gmra.mrb[12].mxu0 %v4717_v3  ;;  %v905_v6 = vor.u32 %v904_v23, %v901_v56  ;;  %v4827_v19 = vcombine.low %v887_v22, %v897_v15  ;;  %v916_v29 = vrot.slane %v915_v12, 4  ;;  %v4845_v56 = vld [vmem:[%s4512_s5 + $0x54] sm:$0xf] }
  0x5b   : > { %3506 = vmatprep.subr.bf16.mxu1 %v4169_v9  ;;  %v920_v9 = vrot.slane %v918_v57, 5  ;;  %v616_v31 = vrot.slane %v614_v14, 5  ;;  %v622_v32 = vrot.slane %v620_v13, 5  ;;  %v626_v35 = vrot.slane %v624_v21, 4  ;;  %v4851_v14 = vld [vmem:[%s4512_s5 + $0x58] sm:$0xf] }
  0x5c   : > { %v613_v17 = vrot.slane %v611_v63, 4  ;;  %v906_v7 = vrot.slane %v905_v6, 4  ;;  %v635_v39 = vshrl.u32 %v4825_v26, 16  ;;  %3808 = vmatprep.mubr.bf16.mxu1 %v4827_v19  ;;  %v638_v55 = vshll.u32 %v4825_v26, 16 }
  0x5d   : > { %v921_v46 = vsel %vm4554_vm2, %v916_v29, %v920_v9  ;;  %v627_v4 = vor.u32 %v626_v35, %v622_v32  ;;  %v632_v57 = vrot.slane %v630_v36, 5  ;;  %v654_v9 = vshll.u32 %v4841_v10, 16 }
  0x5e   : > { %3507 = vmatpush3.bf16.msra.mxu1 %v4170_v37  ;;  %v4832_v37 = vld [vmem:[%s4512_s5 + $0x4c] sm:$0xf]  ;;  %v911_v40 = vsel %vm4554_vm2, %v906_v7, %v910_v16  ;;  %v617_v49 = vor.u32 %v616_v31, %v613_v17  ;;  %v637_v22 = vrot.slane %v635_v39, 4  ;;  %v640_v63 = vrot.slane %v638_v55, 5  ;;  %v4859_v31 = vld [vmem:[%s4512_s5 + $0x5c] sm:$0x1] }
  0x5f   : > { %3812 = vmatprep.subr.bf16.mxu1 %v4798_v52  ;;  %v3080_v23 = vcombine.low %v911_v40, %v921_v46  ;;  %v644_v16 = vshll.u32 %v4832_v37, 16  ;;  %v648_v6 = vshrl.u32 %v4832_v37, 16  ;;  %v628_v12 = vrot.slane %v627_v4, 4  ;;  %v4864_v46 = vld [vmem:[%s4512_s5 + $0x60] sm:$0xf] }
  0x60   : > { %v618_v60 = vrot.slane %v617_v49, 4  ;;  %v659_v15 = vshrl.u32 %v4845_v56, 16  ;;  %v662_v17 = vshll.u32 %v4845_v56, 16  ;;  %v641_v21 = vor.u32 %v640_v63, %v637_v22  ;;  %v4870_v4 = vld [vmem:[%s4512_s5 + $0x64] sm:$0xf] }
  0x61   : > { %3809 = vmatmul.mubr.bf16.gmra.mrb[12].mxu1 %v3080_v23  ;;  %v646_v7 = vrot.slane %v644_v16, 5  ;;  %v650_v29 = vrot.slane %v648_v6, 4  ;;  %v633_v35 = vsel %vm4554_vm2, %v628_v12, %v632_v57  ;;  %v656_v36 = vrot.slane %v654_v9, 5  ;;  %v4879_v16 = vld [vmem:[%s4512_s5 + $0x68] sm:$0x1] }
  0x62   : > { %v623_v13 = vsel %vm4554_vm2, %v618_v60, %v622_v32  ;;  %1636 = vmatprep.mubr.bf16.mxu1 %v4595_v44  ;;  %v661_v39 = vrot.slane %v659_v15, 4  ;;  %v664_v40 = vrot.slane %v662_v17, 5  ;;  %v642_v32 = vrot.slane %v641_v21, 4  ;;  %v4886_v17 = vld [vmem:[%s4512_s5 + $0x6c] sm:$0xf] }
  0x63   : > { %v4866_v49 = vcombine.low %v623_v13, %v633_v35  ;;  %v651_v55 = vor.u32 %v650_v29, %v646_v7  ;;  %v668_v23 = vshll.u32 %v4851_v14, 16  ;;  %v4874_v22 = vcombine.low %v4585_v38, %v4591_v43  ;;  %v4176_v21 = vld [vmem:[%s5751_s1 + $0x88] sm:$0xff]   ;;  %v4898_v29 = vld [vmem:[%s4512_s5 + $0x70] sm:$0xf] }
  0x64   : > { %v665_v60 = vor.u32 %v664_v40, %v661_v39  ;;  %v672_v57 = vshrl.u32 %v4851_v14, 16  ;;  %v678_v63 = vshll.u32 %v4859_v31, 16  ;;  %v647_v6 = vsel %vm4554_vm2, %v642_v32, %v646_v7 }
  0x65   : > { %1202 = vmatprep.mubr.bf16.mxu0 %v4866_v49  ;;  %v652_v12 = vrot.slane %v651_v55, 4  ;;  %v670_v9 = vrot.slane %v668_v23, 5  ;;  %v683_v15 = vshrl.u32 %v4864_v46, 16  ;;  %v4891_v13 = vcombine.low %v4639_v53, %v4643_v24 }
  0x66   : > { %1203 = vmatmul.mubr.bf16.gmra.mrb[16].mxu0 %v4801_v54  ;;  %v666_v38 = vrot.slane %v665_v60, 4  ;;  %v674_v43 = vrot.slane %v672_v57, 4  ;;  %v686_v7 = vshll.u32 %v4864_v46, 16  ;;  %v692_v40 = vshll.u32 %v4870_v4, 16 }
  0x67   : > { %v657_v35 = vsel %vm4554_vm2, %v652_v12, %v656_v36  ;;  %v685_v39 = vrot.slane %v683_v15, 4  ;;  %v696_v32 = vshrl.u32 %v4870_v4, 16  ;;  %v680_v60 = vrot.slane %v678_v63, 5  ;;  %v4179_v63 = vld [vmem:[%s5751_s1 + $0x90] sm:$0xff]  }
  0x68   : > { %v4907_v55 = vcombine.low %v647_v6, %v657_v35  ;;  %v675_v23 = vor.u32 %v674_v43, %v670_v9  ;;  %v688_v57 = vrot.slane %v686_v7, 5  ;;  %v671_v36 = vsel %vm4554_vm2, %v666_v38, %v670_v9 }
  0x69   : > { %1637 = vmatmul.mubr.bf16.vlgmr.msra.gmra.mrb[16].mxu1 %v3045_v5  ;;  %v694_v12 = vrot.slane %v692_v40, 5  ;;  %v698_v15 = vrot.slane %v696_v32, 4  ;;  %v702_v62 = vshll.u32 %v4879_v16, 16  ;;  %v707_v5 = vshrl.u32 %v4886_v17, 16 }
  0x6a   : > { %3813 = vmatpush3.bf16.msra.mxu1 %v4798_v52  ;;  %1644 = vmatprep.mubr.bf16.mxu1 %v4874_v22  ;;  %v676_v41 = vrot.slane %v675_v23, 4  ;;  %v689_v51 = vor.u32 %v688_v57, %v685_v39  ;;  %v710_v52 = vshll.u32 %v4886_v17, 16  ;;  %v716_v38 = vshll.u32 %v4898_v29, 16 }
  0x6b   : > { %1210 = vmatprep.mubr.bf16.mxu0 %v4907_v55  ;;  %3814 = vmatprep.subr.bf16.mxu1 %v4176_v21  ;;  %v699_v6 = vor.u32 %v698_v15, %v694_v12  ;;  %v704_v9 = vrot.slane %v702_v62, 5  ;;  %v720_v43 = vshrl.u32 %v4898_v29, 16  ;;  %v709_v40 = vrot.slane %v707_v5, 4 }
  0x6c   : > { %v681_v7 = vsel %vm4554_vm2, %v676_v41, %v680_v60  ;;  %v690_v35 = vrot.slane %v689_v51, 4  ;;  %v712_v39 = vrot.slane %v710_v52, 5  ;;  %v718_v57 = vrot.slane %v716_v38, 5  ;;  %v4185_v51 = vld [vmem:[%s5751_s1 + $0xa0] sm:$0xff]  }
  0x6d   : > { %v4927_v32 = vcombine.low %v671_v36, %v681_v7  ;;  %v700_v23 = vrot.slane %v699_v6, 4  ;;  %v722_v42 = vrot.slane %v720_v43, 4  ;;  %v726_v62 = vshll.u32 %v4915_v34, 16 }
  0x6e   : > { %3815 = vmatpush3.bf16.msra.mxu1 %v4176_v21  ;;  %1211 = vmatmul.mubr.bf16.gmra.mrb[20].mxu0 %v4866_v49  ;;  %v713_v15 = vor.u32 %v712_v39, %v709_v40  ;;  %v695_v21 = vsel %vm4554_vm2, %v690_v35, %v694_v12  ;;  %v4951_v12 = vcombine.low %v4720_v8, %v4725_v20  ;;  %v3132_v38 = vrot.slane %v4639_v53, 9 }
  0x6f   : > { %3816 = vmatprep.subr.bf16.mxu1 %v4179_v63  ;;  %1218 = vmatprep.mubr.bf16.mxu0 %v4927_v32  ;;  %v723_v60 = vor.u32 %v722_v42, %v718_v57  ;;  %v705_v36 = vsel %vm4554_vm2, %v700_v23, %v704_v9  ;;  %v728_v52 = vrot.slane %v726_v62, 5  ;;  %v4969_v43 = vcombine.low %v4804_v58, %v4810_v61 }
  0x70   : > { %v714_v41 = vrot.slane %v713_v15, 4  ;;  %v4944_v42 = vcombine.low %v695_v21, %v705_v36  ;;  %v1968_v7 = vrot.slane %v4643_v24, 5  ;;  %v1971_v35 = vrot.slane %v4649_v59, 5  ;;  %v4991_v24 = vld [vmem:[%s5751_s1 + $0x200] sm:$0xff]  }
  0x71   : > { %1645 = vmatmul.mubr.bf16.gmra.mrb[20].mxu1 %v4595_v44  ;;  %v724_v5 = vrot.slane %v723_v60, 4  ;;  %v4188_v44 = vld [vmem:[%s5751_s1 + $0xa8] sm:$0xff]   ;;  %v3133_v40 = vrot.slane %v4720_v8, 9  ;;  %v1975_v39 = vrot.slane %v4725_v20, 5  ;;  %v1978_v20 = vrot.slane %v4731_v25, 5 }
  0x72   : > { %1652 = vmatprep.mubr.bf16.mxu1 %v4891_v13  ;;  %3817 = vmatpush3.bf16.msra.mxu1 %v4179_v63  ;;  %v719_v63 = vsel %vm4554_vm2, %v714_v41, %v718_v57  ;;  %v1969_v23 = vsel %vm4979_vm5, %v3132_v38, %v1968_v7  ;;  %v1970_v57 = vrot.slane %v1968_v7, 4  ;;  %v3134_v15 = vrot.slane %v4804_v58, 9 }
  0x73   : > { %3818 = vmatprep.subr.bf16.mxu1 %v4182_v28  ;;  %v729_v6 = vsel %vm4554_vm2, %v724_v5, %v728_v52  ;;  %v1976_v59 = vsel %vm4979_vm5, %v3133_v40, %v1975_v39  ;;  %v1977_v8 = vrot.slane %v1975_v39, 4  ;;  %v1982_v60 = vrot.slane %v4810_v61, 5 }
  0x74   : > { %v4964_v9 = vcombine.low %v719_v63, %v729_v6  ;;  %v1972_v62 = vsel %vm4979_vm5, %v1970_v57, %v1971_v35  ;;  %v1985_v21 = vrot.slane %v4813_v0, 5  ;;  %v5011_v58 = vcombine.low %v4825_v26, %v4832_v37 }
  0x75   : > { %v5001_v36 = vcombine.low %v1969_v23, %v1972_v62  ;;  %v1979_v41 = vsel %vm4979_vm5, %v1977_v8, %v1978_v20  ;;  %v1983_v25 = vsel %vm4979_vm5, %v3134_v15, %v1982_v60  ;;  %v1984_v5 = vrot.slane %v1982_v60, 4 }
  0x76   : > { %3819 = vmatpush3.bf16.msra.mxu1 %v4182_v28  ;;  %1219 = vmatmul.mubr.bf16.gmra.mrb[24].mxu0 %v4907_v55  ;;  %v4191_v28 = vld [vmem:[%s5751_s1 + $0xb0] sm:$0xff]   ;;  %v1989_v52 = vrot.slane %v4832_v37, 5  ;;  %v1992_v63 = vrot.slane %v4841_v10, 5  ;;  %v3136_v37 = vrot.slane %v4845_v56, 9  ;;  %v1999_v10 = vrot.slane %v4859_v31, 5 }
  0x77   : > { %3820 = vmatprep.subr.bf16.mxu1 %v4185_v51  ;;  %1226 = vmatprep.mubr.bf16.mxu0 %v4944_v42  ;;  %v1986_v61 = vsel %vm4979_vm5, %v1984_v5, %v1985_v21  ;;  %v5048_v23 = vcombine.low %v4864_v46, %v4870_v4  ;;  %v2006_v31 = vrot.slane %v4879_v16, 5  ;;  %v5065_v20 = vcombine.low %v4886_v17, %v4898_v29  ;;  %v5081_v21 = vld [vmem:[%s4512_s5 + $0x78] sm:$0xf] }
  0x78   : > { %v5018_v0 = vcombine.low %v1983_v25, %v1986_v61  ;;  %v1991_v6 = vrot.slane %v1989_v52, 4  ;;  %v2010_v16 = vrot.slane %v4898_v29, 5  ;;  %v2013_v15 = vrot.slane %v4915_v34, 5  ;;  %v5097_v29 = vld [vmem:[%s4512_s5 + $0x84] sm:$0xf] }
  0x79   : > { %1653 = vmatmul.mubr.bf16.gmra.mrb[24].mxu1 %v4874_v22  ;;  %v5100_v25 = vld [vmem:[%s4512_s5 + $0x88] sm:$0xf]  ;;  %v5114_v61 = vld [vmem:[%s4512_s5 + $0x94] sm:$0xf] }
  0x7a   : > { %1660 = vmatprep.mubr.bf16.mxu1 %v4951_v12  ;;  %3821 = vmatpush3.bf16.msra.mxu1 %v4185_v51  ;;  %v5005_v51 = vcombine.low %v1976_v59, %v1979_v41  ;;  %v1993_v38 = vsel %vm4979_vm5, %v1991_v6, %v1992_v63  ;;  %v2012_v60 = vrot.slane %v2010_v16, 4  ;;  %v5084_v41 = vld [vmem:[%s4512_s5 + $0x7c] sm:$0xf]  ;;  %v5104_v5 = vcombine.low %v5097_v29, %v5100_v25 }
  0x7b   : > { %3822 = vmatprep.subr.bf16.mxu1 %v4188_v44  ;;  %v5146_v6 = vcombine.low %v4656_v2, %v4671_v18  ;;  %v4198_v2 = vld [vmem:[%s5751_s1 + $0x190] sm:$0xff]   ;;  %v4199_v18 = vld [vmem:[%s5751_s1 + $0x1d8] sm:$0xff]  }
  0x7e   : > { %3823 = vmatpush3.bf16.msra.mxu1 %v4188_v44  ;;  %1227 = vmatmul.mubr.bf16.gmra.mrb[28].mxu0 %v4927_v32  ;;  %v3135_v44 = vrot.slane %v4825_v26, 9  ;;  %v1996_v26 = vrot.slane %v4851_v14, 5 }
  0x7f   : > { %3824 = vmatprep.subr.bf16.mxu1 %v4191_v28  ;;  %1234 = vmatprep.mubr.bf16.mxu0 %v4964_v9 }
  0x80   : > { %v1998_v35 = vrot.slane %v1996_v26, 4  ;;  %v1997_v40 = vsel %vm4979_vm5, %v3136_v37, %v1996_v26  ;;  %v4229_v26 = vld [vmem:[%s4512_s5 + $0x10] sm:$0xf]  ;;  %v4230_v37 = vld [vmem:[%s4512_s5 + $0xc] sm:$0xf] }
  0x81   : > { %1661 = vmatmul.mubr.bf16.gmra.mrb[28].mxu1 %v4891_v13 }
  0x82   : > { %1668 = vmatprep.mubr.bf16.mxu1 %v4969_v43  ;;  %3825 = vmatpush3.bf16.msra.mxu1 %v4191_v28  ;;  %v1990_v28 = vsel %vm4979_vm5, %v3135_v44, %v1989_v52  ;;  %v2000_v39 = vsel %vm4979_vm5, %v1998_v35, %v1999_v10  ;;  %v5128_v44 = vld [vmem:[%s4512_s5 + $0xa0] sm:$0xf]  ;;  %v3130_v10 = vrot.slane %v4230_v37, 9 }
  0x83   : > { %3826 = vmatprep.subr.bf16.mxu1 %v4202_v47  ;;  %v5033_v7 = vcombine.low %v1990_v28, %v1993_v38  ;;  %v5050_v57 = vcombine.low %v1997_v40, %v2000_v39  ;;  %v4200_v28 = vld [vmem:[%s5751_s1 + $0x198] sm:$0xff]   ;;  %v4203_v38 = vld [vmem:[%s5751_s1 + $0x1e0] sm:$0xff]   ;;  %v4231_v40 = vld [vmem:[%s4512_s5 + $0x14] sm:$0x1] }
  0x84   : > { %v1957_v39 = vrot.slane %v4231_v40, 5  ;;  %v4213_v40 = vld [vmem:[%s5751_s1 + $0x208] sm:$0xff]  }
  0x86   : > { %3827 = vmatpush3.bf16.msra.mxu1 %v4202_v47  ;;  %1235 = vmatmul.mubr.bf16.gmra.mrb[32].mxu0 %v4944_v42  ;;  %v5031_v47 = vcombine.low %v4845_v56, %v4851_v14  ;;  %v2003_v56 = vrot.slane %v4870_v4, 5  ;;  %v3137_v14 = vrot.slane %v4864_v46, 9  ;;  %v3138_v46 = vrot.slane %v4886_v17, 9 }
  0x87   : > { %3860 = vmatprep.subr.bf16.mxu1 %v4991_v24  ;;  %1242 = vmatprep.mubr.bf16.mxu0 %v4582_v30  ;;  %v5088_v17 = vcombine.low %v5081_v21, %v5084_v41 }
  0x88   : > { %v2005_v59 = vrot.slane %v2003_v56, 4  ;;  %v2004_v8 = vsel %vm4979_vm5, %v3137_v14, %v2003_v56  ;;  %v2011_v62 = vsel %vm4979_vm5, %v3138_v46, %v2010_v16  ;;  %v5769_v56 = vld [vmem:[#allocation10_spill] sm:$0xff]  ;;  %v5770_v14 = vld [vmem:[#allocation9_spill] sm:$0xff] }
  0x89   : > { %1669 = vmatmul.mubr.bf16.gmra.mrb[32].mxu1 %v4951_v12  ;;  %v4208_v46 = vld [vmem:[%s5751_s1 + $0x1f0] sm:$0xff]  }
  0x8a   : > { %1676 = vmatprep.mubr.bf16.mxu1 %v5011_v58 }
  0x8e   : > { %1243 = vmatmul.mubr.bf16.gmra.mrb[36].mxu0 %v4964_v9 }
  0x8f   : > { %1250 = vmatprep.mubr.bf16.mxu0 %v4618_v27 }
  0x91   : > { %1677 = vmatmul.mubr.bf16.gmra.mrb[36].mxu1 %v4969_v43 }
  0x92   : > { %1684 = vmatprep.mubr.bf16.mxu1 %v5031_v47 }
  0x96   : > { %1251 = vmatmul.mubr.bf16.gmra.mrb[40].mxu0 %v4582_v30  ;;  %v2007_v30 = vsel %vm4979_vm5, %v2005_v59, %v2006_v31  ;;  %v5189_v31 = vcombine.low %v5770_v14, %v5769_v56  ;;  %v4206_v59 = vld [vmem:[%s5751_s1 + $0x1a8] sm:$0xff]  }
  0x97   : > { %1258 = vmatprep.mubr.bf16.mxu0 %v4668_v11  ;;  %v5067_v4 = vcombine.low %v2004_v8, %v2007_v30  ;;  %v4232_v8 = vld [vmem:[%s4512_s5 + $0x4] sm:$0xf] }
  0x98   : > { %v1947_v30 = vrot.slane %v4232_v8, 5 }
  0x99   : > { %1685 = vmatmul.mubr.bf16.gmra.mrb[40].mxu1 %v5011_v58 }
  0x9a   : > { %1692 = vmatprep.mubr.bf16.mxu1 %v5048_v23 }
  0x9e   : > { %1259 = vmatmul.mubr.bf16.gmra.mrb[44].mxu0 %v4618_v27  ;;  %v2014_v27 = vsel %vm4979_vm5, %v2012_v60, %v2013_v15  ;;  %v4233_v15 = vld [vmem:[%s4512_s5 + $0x1c] sm:$0xf] }
  0x9f   : > { %1266 = vmatprep.mubr.bf16.mxu0 %v4697_v50  ;;  %v5090_v34 = vcombine.low %v2011_v62, %v2014_v27  ;;  %v4234_v62 = vld [vmem:[%s4512_s5 + $0x8] sm:$0x1]  ;;  %v4209_v27 = vld [vmem:[%s5751_s1 + $0x1b0] sm:$0xff]  }
  0xa0   : > { %v1950_v60 = vrot.slane %v4234_v62, 5 }
  0xa1   : > { %1693 = vmatmul.mubr.bf16.gmra.mrb[44].mxu1 %v5031_v47 }
  0xa2   : > { %1700 = vmatprep.mubr.bf16.mxu1 %v5065_v20 }
  0xa6   : > { %1267 = vmatmul.mubr.bf16.gmra.mrb[48].mxu0 %v4668_v11  ;;  %v5111_v11 = vld [vmem:[%s4512_s5 + $0x90] sm:$0xf] }
  0xa7   : > { %1274 = vmatprep.mubr.bf16.mxu0 %v4750_v45  ;;  %v5118_v52 = vcombine.low %v5111_v11, %v5114_v61 }
  0xa9   : > { %1701 = vmatmul.mubr.bf16.gmra.mrb[48].mxu1 %v5048_v23 }
  0xaa   : > { %1708 = vmatprep.mubr.bf16.mxu1 %v5088_v17 }
  0xae   : > { %1275 = vmatmul.mubr.bf16.gmra.mrb[52].mxu0 %v4697_v50  ;;  %v5125_v50 = vld [vmem:[%s4512_s5 + $0x9c] sm:$0xf] }
  0xaf   : > { %1282 = vmatprep.mubr.bf16.mxu0 %v4783_v1  ;;  %v5132_v63 = vcombine.low %v5125_v50, %v5128_v44 }
  0xb1   : > { %1709 = vmatmul.mubr.bf16.gmra.mrb[52].mxu1 %v5065_v20 }
  0xb2   : > { %1716 = vmatprep.mubr.bf16.mxu1 %v5104_v5 }
  0xb6   : > { %1283 = vmatmul.mubr.bf16.gmra.mrb[56].mxu0 %v4750_v45  ;;  %v4193_v45 = vld [vmem:[%s5751_s1 + $0x180] sm:$0xff]  }
  0xb7   : > { %1290 = vmatprep.mubr.bf16.mxu0 %v4827_v19  ;;  %v4194_v19 = vld [vmem:[%s5751_s1 + $0x1c8] sm:$0xff]  }
  0xb9   : > { %1717 = vmatmul.mubr.bf16.gmra.mrb[56].mxu1 %v5088_v17 }
  0xba   : > { %1724 = vmatprep.mubr.bf16.mxu1 %v5118_v52 }
  0xbe   : > { %1291 = vmatmul.mubr.bf16.gmra.mrb[60].mxu0 %v4783_v1  ;;  %v4197_v1 = vld [vmem:[%s5751_s1 + $0x1d0] sm:$0xff]  }
  0xbf   : > { %3780 = vmatprep.mubr.bf16.mxu0 %v4636_v48  ;;  %v4195_v48 = vld [vmem:[%s5751_s1 + $0x188] sm:$0xff]  }
  0xc1   : > { %1725 = vmatmul.mubr.bf16.gmra.mrb[60].mxu1 %v5104_v5 }
  0xc2   : > { %1732 = vmatprep.mubr.bf16.mxu1 %v5132_v63 }
  0xc6   : > { %3781 = vmatmul.mubr.bf16.vlgmr.msra.gmra.mrb[64].mxu0 %v4717_v3  ;;  %v5768_v3 = vld [vmem:[#allocation8_spill] sm:$0xff] }
  0xc7   : > { %3629 = vmatpush3.bf16.msra.mxu0 %v4193_v45  ;;  %3784 = vmatprep.mubr.bf16.mxu0 %v4801_v54  ;;  %v5166_v54 = vcombine.low %v5768_v3, %v4685_v33  ;;  %v1954_v33 = vrot.slane %v4229_v26, 5 }
  0xc8   : > { %3630 = vmatprep.subr.bf16.mxu0 %v4194_v19  ;;  %v4235_v19 = vld [vmem:[%s4512_s5] sm:$0xf] }
  0xc9   : > { %1733 = vmatmul.mubr.bf16.gmra.mrb[64].mxu1 %v5118_v52  ;;  %v1956_v35 = vrot.slane %v1954_v33, 4 }
  0xca   : > { %1740 = vmatprep.mubr.bf16.mxu1 %v5146_v6 }
  0xcb   : > { %3631 = vmatpush3.bf16.msra.mxu0 %v4195_v48  ;;  %v1958_v16 = vsel %vm4979_vm5, %v1956_v35, %v1957_v39  ;;  %v3129_v48 = vrot.slane %v4235_v19, 9  ;;  %v4215_v39 = vld [vmem:[%s5751_s1 + $0x218] sm:$0xff]  }
  0xcc   : > { %3632 = vmatprep.subr.bf16.mxu0 %v4197_v1  ;;  %v1949_v1 = vrot.slane %v1947_v30, 4 }
  0xce   : > { %3785 = vmatmul.mubr.bf16.gmra.mrb[68].mxu0 %v4866_v49  ;;  %v4204_v49 = vld [vmem:[%s5751_s1 + $0x1a0] sm:$0xff]  }
  0xcf   : > { %3633 = vmatpush3.bf16.msra.mxu0 %v4198_v2  ;;  %3788 = vmatprep.mubr.bf16.mxu0 %v4907_v55  ;;  %v4205_v55 = vld [vmem:[%s5751_s1 + $0x1e8] sm:$0xff]   ;;  %v4210_v2 = vld [vmem:[%s5751_s1 + $0x1f8] sm:$0xff]  }
  0xd0   : > { %3634 = vmatprep.subr.bf16.mxu0 %v4199_v18  ;;  %v4236_v18 = vld [vmem:[%s4512_s5 + $0x18] sm:$0xf] }
  0xd1   : > { %1741 = vmatmul.mubr.bf16.gmra.mrb[68].mxu1 %v5132_v63  ;;  %v3131_v3 = vrot.slane %v4236_v18, 9 }
  0xd2   : > { %1748 = vmatprep.mubr.bf16.mxu1 %v5166_v54 }
  0xd3   : > { %3635 = vmatpush3.bf16.msra.mxu0 %v4200_v28 }
  0xd4   : > { %3636 = vmatprep.subr.bf16.mxu0 %v4203_v38  ;;  %v4237_v38 = vld [vmem:[%s4512_s5 + $0x20] sm:$0x1] }
  0xd5   : > { %v1964_v26 = vrot.slane %v4237_v38, 5 }
  0xd6   : > { %3789 = vmatmul.mubr.bf16.gmra.mrb[72].mxu0 %v4927_v32  ;;  %v1955_v32 = vsel %vm4979_vm5, %v3130_v10, %v1954_v33  ;;  %v4211_v33 = vld [vmem:[%s5751_s1 + $0x1b8] sm:$0xff]  }
  0xd7   : > { %3637 = vmatpush3.bf16.msra.mxu0 %v4204_v49  ;;  %3792 = vmatprep.mubr.bf16.mxu0 %v4944_v42  ;;  %v1961_v42 = vrot.slane %v4233_v15, 5  ;;  %v3148_v45 = vcombine.low %v1955_v32, %v1958_v16  ;;  %v1948_v49 = vsel %vm4979_vm5, %v3129_v48, %v1947_v30  ;;  %v3139_v16 = vrot.slane %v5081_v21, 9 }
  0xd8   : > { %3638 = vmatprep.subr.bf16.mxu0 %v4205_v55  ;;  %v1951_v55 = vsel %vm4979_vm5, %v1949_v1, %v1950_v60 }
  0xd9   : > { %1749 = vmatmul.mubr.bf16.gmra.mrb[72].mxu1 %v5146_v6  ;;  %v1963_v28 = vrot.slane %v1961_v42, 4  ;;  %v1962_v37 = vsel %vm4979_vm5, %v3131_v3, %v1961_v42  ;;  %v3147_v10 = vcombine.low %v1948_v49, %v1951_v55  ;;  %v4239_v42 = vld [vmem:[%s4512_s5 + $0x80] sm:$0x1]  ;;  %v4240_v3 = vld [vmem:[%s4512_s5 + $0x8c] sm:$0x1]  ;;  %v3141_v49 = vrot.slane %v5111_v11, 9 }
  0xda   : > { %1756 = vmatprep.mubr.bf16.mxu1 %v5189_v31  ;;  %v2020_v62 = vrot.slane %v4239_v42, 5 }
  0xdb   : > { %3639 = vmatpush3.bf16.msra.mxu0 %v4206_v59 }
  0xdc   : > { %3640 = vmatprep.subr.bf16.mxu0 %v4208_v46  ;;  %v2017_v46 = vrot.slane %v5084_v41, 5 }
  0xde   : > { %3793 = vmatmul.mubr.bf16.gmra.mrb[76].mxu0 %v4964_v9  ;;  %v1965_v9 = vsel %vm4979_vm5, %v1963_v28, %v1964_v26  ;;  %v2019_v15 = vrot.slane %v2017_v46, 4  ;;  %v2027_v28 = vrot.slane %v4240_v3, 5  ;;  %v2031_v26 = vrot.slane %v5114_v61, 5 }
  0xdf   : > { %3641 = vmatpush3.bf16.msra.mxu0 %v4209_v27  ;;  %2321 = vmatprep.mubr.bf16.mxu0 %v3148_v45  ;;  %v5231_v35 = vcombine.low %v1962_v37, %v1965_v9  ;;  %v2024_v27 = vrot.slane %v5100_v25, 5  ;;  %v4241_v37 = vld [vmem:[%s4512_s5 + $0x98] sm:$0x1] }
  0xe0   : > { %3642 = vmatprep.subr.bf16.mxu0 %v4210_v2  ;;  %v2021_v60 = vsel %vm4979_vm5, %v2019_v15, %v2020_v62  ;;  %v3140_v2 = vrot.slane %v5097_v29, 9  ;;  %v2033_v55 = vrot.slane %v2031_v26, 4  ;;  %v2034_v9 = vrot.slane %v4241_v37, 5 }
  0xe1   : > { %1757 = vmatmul.mubr.bf16.gmra.mrb[76].mxu1 %v5166_v54  ;;  %v2026_v18 = vrot.slane %v2024_v27, 4  ;;  %v2032_v11 = vsel %vm4979_vm5, %v3141_v49, %v2031_v26  ;;  %v4248_v49 = vld [vmem:[%s4512_s5 + $0xbc] sm:$0x1] }
  0xe2   : > { %3828 = vmatprep.mubr.bf16.mxu1 %v4874_v22  ;;  %v4214_v22 = vld [vmem:[%s5751_s1 + $0x210] sm:$0xff]   ;;  %v2025_v25 = vsel %vm4979_vm5, %v3140_v2, %v2024_v27  ;;  %v2035_v61 = vsel %vm4979_vm5, %v2033_v55, %v2034_v9  ;;  %v2055_v55 = vrot.slane %v4248_v49, 5 }
  0xe3   : > { %3643 = vmatpush3.bf16.msra.mxu0 %v4211_v33  ;;  %v2028_v38 = vsel %vm4979_vm5, %v2026_v18, %v2027_v28 }
  0xe4   : > { %v5322_v29 = vcombine.low %v2025_v25, %v2028_v38  ;;  %v4247_v38 = vld [vmem:[%s4512_s5 + $0xb4] sm:$0xf] }
  0xe5   : > { %v3144_v26 = vrot.slane %v4247_v38, 9 }
  0xe6   : > { %2322 = vmatmul.mubr.bf16.vlgmr.msra.gmra.mrb[80].mxu0 %v3147_v10 }
  0xe7   : > { %2329 = vmatprep.mubr.bf16.mxu0 %v5231_v35 }
  0xe9   : > { %3829 = vmatmul.mubr.bf16.vlgmr.msra.gmra.mrb[80].mxu1 %v4891_v13  ;;  %v4216_v13 = vld [vmem:[%s5751_s1 + $0x220] sm:$0xff]  }
  0xea   : > { %3861 = vmatpush3.bf16.msra.mxu1 %v4991_v24  ;;  %3832 = vmatprep.mubr.bf16.mxu1 %v4951_v12  ;;  %v4217_v12 = vld [vmem:[%s5751_s1 + $0x228] sm:$0xff]   ;;  %v4220_v24 = vld [vmem:[%s5751_s1 + $0x238] sm:$0xff]  }
  0xeb   : > { %3862 = vmatprep.subr.bf16.mxu1 %v4213_v40 }
  0xee   : > { %3863 = vmatpush3.bf16.msra.mxu1 %v4213_v40  ;;  %2330 = vmatmul.mubr.bf16.gmra.mrb[84].mxu0 %v3148_v45 }
  0xef   : > { %3864 = vmatprep.subr.bf16.mxu1 %v4214_v22  ;;  %2337 = vmatprep.mubr.bf16.mxu0 %v5001_v36 }
  0xf1   : > { %3833 = vmatmul.mubr.bf16.gmra.mrb[84].mxu1 %v4969_v43  ;;  %v4218_v43 = vld [vmem:[%s5751_s1 + $0x230] sm:$0xff]  }
  0xf2   : > { %3836 = vmatprep.mubr.bf16.mxu1 %v5011_v58  ;;  %3865 = vmatpush3.bf16.msra.mxu1 %v4214_v22  ;;  %v2038_v22 = vrot.slane %v5128_v44, 5  ;;  %v4243_v44 = vld [vmem:[%s4512_s5 + $0xac] sm:$0xf] }
  0xf3   : > { %3866 = vmatprep.subr.bf16.mxu1 %v4215_v39 }
  0xf6   : > { %3867 = vmatpush3.bf16.msra.mxu1 %v4215_v39  ;;  %2338 = vmatmul.mubr.bf16.gmra.mrb[88].mxu0 %v5231_v35  ;;  %v5339_v39 = vcombine.low %v2032_v11, %v2035_v61  ;;  %v4249_v61 = vld [vmem:[%s4512_s5 + $0xc4] sm:$0xf] }
  0xf7   : > { %3868 = vmatprep.subr.bf16.mxu1 %v4216_v13  ;;  %2345 = vmatprep.mubr.bf16.mxu0 %v5005_v51 }
  0xf9   : > { %3837 = vmatmul.mubr.bf16.gmra.mrb[88].mxu1 %v5031_v47 }
  0xfa   : > { %3840 = vmatprep.mubr.bf16.mxu1 %v5048_v23  ;;  %3869 = vmatpush3.bf16.msra.mxu1 %v4216_v13  ;;  %v3142_v13 = vrot.slane %v5125_v50, 9 }
  0xfb   : > { %3870 = vmatprep.subr.bf16.mxu1 %v4217_v12 }
  0xfe   : > { %3871 = vmatpush3.bf16.msra.mxu1 %v4217_v12  ;;  %2346 = vmatmul.mubr.bf16.gmra.mrb[92].mxu0 %v5001_v36  ;;  %v2040_v12 = vrot.slane %v2038_v22, 4 }
  0xff   : > { %3872 = vmatprep.subr.bf16.mxu1 %v4218_v43  ;;  %2353 = vmatprep.mubr.bf16.mxu0 %v5018_v0 }
 0x101   : > { %3841 = vmatmul.mubr.bf16.gmra.mrb[92].mxu1 %v5065_v20 }
 0x102   : > { %3844 = vmatprep.mubr.bf16.mxu1 %v5088_v17  ;;  %3873 = vmatpush3.bf16.msra.mxu1 %v4218_v43  ;;  %v4242_v43 = vld [vmem:[%s4512_s5 + $0xa4] sm:$0x1] }
 0x103   : > { %3874 = vmatprep.subr.bf16.mxu1 %v4220_v24 }
 0x106   : > { %3875 = vmatpush3.bf16.msra.mxu1 %v4220_v24  ;;  %2354 = vmatmul.mubr.bf16.gmra.mrb[96].mxu0 %v5005_v51  ;;  %v2039_v24 = vsel %vm4979_vm5, %v3142_v13, %v2038_v22  ;;  %v2060_v22 = vrot.slane %v4249_v61, 5 }
 0x107   : > { %2361 = vmatprep.mubr.bf16.mxu0 %v5033_v7 }
 0x109   : > { %3845 = vmatmul.mubr.bf16.gmra.mrb[0].mxu1 %v5104_v5 }
 0x10a   : > { %3848 = vmatprep.mubr.bf16.mxu1 %v5118_v52 }
 0x10e   : > { %v3372_v58 = vpop.f32.mrb[0].mxu0  ;;  %2362 = vmatmul.mubr.bf16.gmra.mrb[100].mxu0 %v5018_v0 }
 0x10f   : > { %v3373_v47 = vpop.f32.mrb[1].mxu0  ;;  %2369 = vmatprep.mubr.bf16.mxu0 %v5050_v57 }
 0x110   : > { %v5273_v23 = vadd.f32 %v3373_v47, %v3372_v58  ;;  %v3375_v56 = vpop.f32.mrb[2].mxu0  ;;  %v2045_v58 = vrot.slane %v4243_v44, 5 }
 0x111   : > { %v3376_v14 = vpop.f32.mrb[3].mxu0  ;;  %3849 = vmatmul.mubr.bf16.gmra.mrb[4].mxu1 %v5132_v63  ;;  %v5291_v63 = vld [vmem:[%s4512_s5 + $0xcc] sm:$0xf] }
 0x112   : > { %v5275_v20 = vadd.f32 %v3376_v14, %v3375_v56  ;;  %3852 = vmatprep.mubr.bf16.mxu1 %v5146_v6  ;;  %v5771_v6 = vld [vmem:[#allocation11_spill] sm:$0xff] }
 0x113   : > { %v3062_v32 = vcombine.low %v5291_v63, %v5771_v6  ;;  %v2047_v6 = vrot.slane %v2045_v58, 4 }
 0x116   : > { %v3378_v17 = vpop.f32.mrb[4].mxu0  ;;  %2370 = vmatmul.mubr.bf16.gmra.mrb[104].mxu0 %v5033_v7 }
 0x117   : > { %v3379_v5 = vpop.f32.mrb[5].mxu0  ;;  %2377 = vmatprep.mubr.bf16.mxu0 %v5067_v4 }
 0x118   : > { %v5281_v52 = vadd.f32 %v3379_v5, %v3378_v17  ;;  %v3381_v59 = vpop.f32.mrb[6].mxu0 }
 0x119   : > { %v3382_v8 = vpop.f32.mrb[7].mxu0  ;;  %3853 = vmatmul.mubr.bf16.gmra.mrb[8].mxu1 %v5166_v54 }
 0x11a   : > { %v5284_v30 = vadd.f32 %v3382_v8, %v3381_v59  ;;  %3856 = vmatprep.mubr.bf16.mxu1 %v5189_v31  ;;  %v2018_v31 = vsel %vm4979_vm5, %v3139_v16, %v2017_v46  ;;  %v4244_v8 = vld [vmem:[%s4512_s5 + $0xa8] sm:$0xf] }
 0x11b   : > { %v5309_v1 = vcombine.low %v2018_v31, %v2021_v60  ;;  %v3143_v46 = vrot.slane %v4244_v8, 9  ;;  %v4246_v60 = vld [vmem:[%s4512_s5 + $0xb8] sm:$0xf] }
 0x11c   : > { %v2052_v27 = vrot.slane %v4246_v60, 5 }
 0x11e   : > { %2378 = vmatmul.mubr.bf16.gmra.mrb[108].mxu0 %v5050_v57  ;;  %v3384_v54 = vpop.f32.mrb[8].mxu0 }
 0x11f   : > { %2385 = vmatprep.mubr.bf16.mxu0 %v5090_v34  ;;  %v3385_v41 = vpop.f32.mrb[9].mxu0 }
 0x120   : > { %v5305_v21 = vadd.f32 %v3385_v41, %v3384_v54  ;;  %v3387_v45 = vpop.f32.mrb[10].mxu0  ;;  %v2046_v41 = vsel %vm4979_vm5, %v3143_v46, %v2045_v58  ;;  %v4250_v58 = vld [vmem:[%s4512_s5 + $0xc0] sm:$0xf] }
 0x121   : > { %3857 = vmatmul.mubr.bf16.gmra.mrb[12].mxu1 %v3062_v32  ;;  %v3388_v19 = vpop.f32.mrb[11].mxu0  ;;  %v4245_v32 = vld [vmem:[%s4512_s5 + $0xb0] sm:$0x1] }
 0x122   : > { %3876 = vmatprep.mubr.bf16.mxu1 %v5231_v35  ;;  %v5307_v48 = vadd.f32 %v3388_v19, %v3387_v45  ;;  %v2048_v16 = vrot.slane %v4245_v32, 5 }
 0x124   : > { %v2049_v31 = vsel %vm4979_vm5, %v2047_v6, %v2048_v16 }
 0x125   : > { %v3161_v28 = vcombine.low %v2046_v41, %v2049_v31 }
 0x126   : > { %2386 = vmatmul.mubr.bf16.gmra.mrb[112].mxu0 %v5067_v4 }
 0x127   : > { %2393 = vmatprep.mubr.bf16.mxu0 %v5309_v1 }
 0x129   : > { %3877 = vmatmul.mubr.bf16.vlgmr.msra.gmra.mrb[80].mxu1 %v5001_v36 }
 0x12a   : > { %3880 = vmatprep.mubr.bf16.mxu1 %v5005_v51 }
 0x12d   : > { %v3390_v33 = vpop.f32.mrb[12].mxu0 }
 0x12e   : > { %v3391_v36 = vpop.f32.mrb[13].mxu0  ;;  %2394 = vmatmul.mubr.bf16.gmra.mrb[116].mxu0 %v5090_v34 }
 0x12f   : > { %v5327_v10 = vadd.f32 %v3391_v36, %v3390_v33  ;;  %v3393_v35 = vpop.f32.mrb[14].mxu0  ;;  %2401 = vmatprep.mubr.bf16.mxu0 %v5322_v29  ;;  %v2054_v33 = vrot.slane %v2052_v27, 4 }
 0x130   : > { %v3394_v40 = vpop.f32.mrb[15].mxu0 }
 0x131   : > { %3881 = vmatmul.mubr.bf16.gmra.mrb[84].mxu1 %v5018_v0  ;;  %v5331_v51 = vadd.f32 %v3394_v40, %v3393_v35  ;;  %v2041_v0 = vrot.slane %v4242_v43, 5  ;;  %v2053_v40 = vsel %vm4979_vm5, %v3144_v26, %v2052_v27  ;;  %v2056_v11 = vsel %vm4979_vm5, %v2054_v33, %v2055_v55  ;;  %v4253_v26 = vld [vmem:[%s4512_s5 + $0xd4] sm:$0x1] }
 0x132   : > { %3884 = vmatprep.mubr.bf16.mxu1 %v5033_v7  ;;  %v2071_v33 = vrot.slane %v4253_v26, 5 }
 0x133   : > { %v2042_v7 = vsel %vm4979_vm5, %v2040_v12, %v2041_v0 }
 0x134   : > { %v5354_v5 = vcombine.low %v2039_v24, %v2042_v7  ;;  %v3162_v7 = vcombine.low %v2053_v40, %v2056_v11 }
 0x136   : > { %2402 = vmatmul.mubr.bf16.gmra.mrb[120].mxu0 %v5309_v1 }
 0x137   : > { %2409 = vmatprep.mubr.bf16.mxu0 %v5339_v39 }
 0x139   : > { %3885 = vmatmul.mubr.bf16.gmra.mrb[88].mxu1 %v5050_v57  ;;  %v3396_v50 = vpop.f32.mrb[16].mxu0 }
 0x13a   : > { %3888 = vmatprep.mubr.bf16.mxu1 %v5067_v4  ;;  %v3397_v47 = vpop.f32.mrb[17].mxu0 }
 0x13b   : > { %v5352_v14 = vadd.f32 %v3397_v47, %v3396_v50  ;;  %v3399_v17 = vpop.f32.mrb[18].mxu0  ;;  %v3145_v50 = vrot.slane %v4250_v58, 9  ;;  %v2062_v47 = vrot.slane %v2060_v22, 4 }
 0x13c   : > { %v3508_v56 = vpop.f32.mrb[16].mxu1  ;;  %v3400_v59 = vpop.f32.mrb[19].mxu0 }
 0x13d   : > { %v3509_v57 = vpop.f32.mrb[17].mxu1  ;;  %v5360_v62 = vadd.f32 %v3400_v59, %v3399_v17  ;;  %v2061_v6 = vsel %vm4979_vm5, %v3145_v50, %v2060_v22 }
 0x13e   : > { %v5358_v15 = vadd.f32 %v3509_v57, %v3508_v56  ;;  %v3511_v42 = vpop.f32.mrb[18].mxu1  ;;  %2410 = vmatmul.mubr.bf16.gmra.mrb[124].mxu0 %v5322_v29  ;;  %v4251_v56 = vld [vmem:[%s4512_s5 + $0xc8] sm:$0x1] }
 0x13f   : > { %v3512_v4 = vpop.f32.mrb[19].mxu1  ;;  %2417 = vmatprep.mubr.bf16.mxu0 %v5354_v5  ;;  %v2063_v17 = vrot.slane %v4251_v56, 5 }
 0x140   : > { %v5363_v54 = vadd.f32 %v3512_v4, %v3511_v42  ;;  %v4252_v42 = vld [vmem:[%s4512_s5 + $0xd0] sm:$0xf]  ;;  %s5599_s5 = sand.u32 1, %s4340_s13  }
 0x141   : > { %3889 = vmatmul.mubr.bf16.gmra.mrb[92].mxu1 %v5090_v34  ;;  %v3402_v45 = vpop.f32.mrb[20].mxu0  ;;  %v2064_v32 = vsel %vm4979_vm5, %v2062_v47, %v2063_v17  ;;  %v2068_v4 = vrot.slane %v4252_v42, 5  ;;  %s3042_s8 = sshll.u32 %s5599_s5, 7  ;;  %s2913_s24 = scalar_lea.sflag [#allocation3], %s5599_s5 }
 0x142   : > { %3892 = vmatprep.mubr.bf16.mxu1 %v5309_v1  ;;  %v3403_v19 = vpop.f32.mrb[21].mxu0  ;;  %s5611_s9 = scalar_lea.vmem [#allocation2], %s3042_s8 }
 0x143   : > { %v5373_v18 = vadd.f32 %v3403_v19, %v3402_v45  ;;  %v3405_v3 = vpop.f32.mrb[22].mxu0  ;;  %v3163_v45 = vcombine.low %v2061_v6, %v2064_v32  ;;  %v2070_v38 = vrot.slane %v2068_v4, 4  ;;  %s2931_s11 = sshll.u32 %s5611_s9, 4  ;;  %s5674_s11 = int_to_ptr.vmem [resolvable:$true] %s2931_s11 }
 0x144   : > { %v3514_v2 = vpop.f32.mrb[20].mxu1  ;;  %v3406_v34 = vpop.f32.mrb[23].mxu0  ;;  %s4254_s25 = scalar_lea.vmem %s5674_s11, 2048  ;;  %p4261_p0 = scmp.lt.s32.totalorder %s5674_s11, %s4259_s27 }
 0x145   : > { %v3515_v25 = vpop.f32.mrb[21].mxu1  ;;  %v5379_v36 = vadd.f32 %v3406_v34, %v3405_v3  ;;  %p4255_p11 = scmp.ne.s32.totalorder %s5674_s11, %s4254_s25  ;;  %p4262_p1 = scmp.lt.s32.totalorder %s4260_s28, %s4254_s25 }
 0x146   : > { %v5377_v37 = vadd.f32 %v3515_v25, %v3514_v2  ;;  %v3517_v9 = vpop.f32.mrb[22].mxu1  ;;  %2418 = vmatmul.mubr.bf16.gmra.mrb[128].mxu0 %v5339_v39 }
 0x147   : > { %v3518_v1 = vpop.f32.mrb[23].mxu1  ;;  %2425 = vmatprep.mubr.bf16.mxu0 %v3161_v28  ;;  %p4256_p12 = pnand %p4255_p11, %p4412_p5  ;;  %p4263_p2 = por %p4262_p1, %p4261_p0 }
 0x148   : > { %v5382_v35 = vadd.f32 %v3518_v1, %v3517_v9 }
 0x149   : > { %3893 = vmatmul.mubr.bf16.gmra.mrb[0].mxu1 %v5322_v29  ;;  %v3408_v13 = vpop.f32.mrb[24].mxu0  ;;  %p4257_p13 = pneg %p4256_p12 }
 0x14a   : > { %3896 = vmatprep.mubr.bf16.mxu1 %v5339_v39  ;;  %v3409_v12 = vpop.f32.mrb[25].mxu0 }
 0x14b   : > { %v5391_v0 = vadd.f32 %v3409_v12, %v3408_v13  ;;  %v3411_v24 = vpop.f32.mrb[26].mxu0  ;;  %p4264_p3 = pnand %p4263_p2, %p4257_p13 }
 0x14c   : > { %v3520_v43 = vpop.f32.mrb[24].mxu1  ;;  %v3412_v29 = vpop.f32.mrb[27].mxu0 }
 0x14d   : > { %v3521_v44 = vpop.f32.mrb[25].mxu1  ;;  %v5397_v8 = vadd.f32 %v3412_v29, %v3411_v24 }
 0x14e   : > { %v5395_v57 = vadd.f32 %v3521_v44, %v3520_v43  ;;  %v3523_v59 = vpop.f32.mrb[26].mxu1  ;;  %2426 = vmatmul.mubr.bf16.gmra.mrb[132].mxu0 %v5354_v5 }
 0x14f   : > { %v3524_v39 = vpop.f32.mrb[27].mxu1  ;;  %2433 = vmatprep.mubr.bf16.mxu0 %v3162_v7 }
 0x150   : > { %v5400_v46 = vadd.f32 %v3524_v39, %v3523_v59 }
 0x151   : > { %3897 = vmatmul.mubr.bf16.gmra.mrb[4].mxu1 %v5354_v5  ;;  %v3414_v16 = vpop.f32.mrb[28].mxu0  ;;  %v3146_v5 = vrot.slane %v5291_v63, 9  ;;  %v2072_v63 = vsel %vm4979_vm5, %v2070_v38, %v2071_v33 }
 0x152   : > { %3900 = vmatprep.mubr.bf16.mxu1 %v3161_v28  ;;  %v3415_v41 = vpop.f32.mrb[29].mxu0 }
 0x153   : > { %v5408_v60 = vadd.f32 %v3415_v41, %v3414_v16  ;;  %v3417_v27 = vpop.f32.mrb[30].mxu0  ;;  %v2069_v1 = vsel %vm4979_vm5, %v3146_v5, %v2068_v4 }
 0x154   : > { %v3526_v31 = vpop.f32.mrb[28].mxu1  ;;  %v3418_v2 = vpop.f32.mrb[31].mxu0  ;;  %v3164_v43 = vcombine.low %v2069_v1, %v2072_v63 }
 0x155   : > { %v3527_v19 = vpop.f32.mrb[29].mxu1  ;;  %v5413_v34 = vadd.f32 %v3418_v2, %v3417_v27 }
 0x156   : > { %v5411_v3 = vadd.f32 %v3527_v19, %v3526_v31  ;;  %v3529_v25 = vpop.f32.mrb[30].mxu1  ;;  %2434 = vmatmul.mubr.bf16.gmra.mrb[136].mxu0 %v3161_v28 }
 0x157   : > { %v3530_v49 = vpop.f32.mrb[31].mxu1  ;;  %2441 = vmatprep.mubr.bf16.mxu0 %v3163_v45 }
 0x158   : > { %v5416_v55 = vadd.f32 %v3530_v49, %v3529_v25 }
 0x159   : > { %3901 = vmatmul.mubr.bf16.gmra.mrb[8].mxu1 %v3162_v7  ;;  %v3420_v9 = vpop.f32.mrb[32].mxu0 }
 0x15a   : > { %3904 = vmatprep.mubr.bf16.mxu1 %v3163_v45  ;;  %v3421_v40 = vpop.f32.mrb[33].mxu0 }
 0x15b   : > { %v3422_v61 = vadd.f32 %v3421_v40, %v3420_v9  ;;  %v3423_v22 = vpop.f32.mrb[34].mxu0 }
 0x15c   : > { %v3532_v11 = vpop.f32.mrb[32].mxu1  ;;  %v3424_v12 = vpop.f32.mrb[35].mxu0 }
 0x15d   : > { %v3533_v13 = vpop.f32.mrb[33].mxu1  ;;  %v3425_v44 = vadd.f32 %v3424_v12, %v3423_v22 }
 0x15e   : > { %v5422_v28 = vadd.f32 %v3533_v13, %v3532_v11  ;;  %v3535_v24 = vpop.f32.mrb[34].mxu1  ;;  %2442 = vmatmul.mubr.bf16.gmra.mrb[140].mxu0 %v3162_v7 }
 0x15f   : > { %v3536_v29 = vpop.f32.mrb[35].mxu1 }
 0x160   : > { %v5424_v58 = vadd.f32 %v3536_v29, %v3535_v24 }
 0x161   : > { %3905 = vmatmul.mubr.bf16.gmra.mrb[12].mxu1 %v3164_v43  ;;  %v3426_v50 = vpop.f32.mrb[36].mxu0 }
 0x162   : > { %v3427_v47 = vpop.f32.mrb[37].mxu0 }
 0x163   : > { %v3428_v56 = vadd.f32 %v3427_v47, %v3426_v50  ;;  %v3429_v17 = vpop.f32.mrb[38].mxu0 }
 0x164   : > { %v3538_v53 = vpop.f32.mrb[36].mxu1  ;;  %v3430_v39 = vpop.f32.mrb[39].mxu0 }
 0x165   : > { %v3539_v59 = vpop.f32.mrb[37].mxu1  ;;  %v3431_v16 = vadd.f32 %v3430_v39, %v3429_v17 }
 0x166   : > { %v5426_v6 = vadd.f32 %v3539_v59, %v3538_v53  ;;  %v3541_v32 = vpop.f32.mrb[38].mxu1 }
 0x167   : > { %v3542_v42 = vpop.f32.mrb[39].mxu1 }
 0x168   : > { %v5428_v4 = vadd.f32 %v3542_v42, %v3541_v32 }
 0x169   : > { %v3432_v41 = vpop.f32.mrb[40].mxu0 }
 0x16a   : > { %v3433_v31 = vpop.f32.mrb[41].mxu0 }
 0x16b   : > { %v3434_v27 = vadd.f32 %v3433_v31, %v3432_v41  ;;  %v3435_v45 = vpop.f32.mrb[42].mxu0 }
 0x16c   : > { %v3544_v7 = vpop.f32.mrb[40].mxu1  ;;  %v3436_v2 = vpop.f32.mrb[43].mxu0 }
 0x16d   : > { %v3545_v19 = vpop.f32.mrb[41].mxu1  ;;  %v3437_v38 = vadd.f32 %v3436_v2, %v3435_v45 }
 0x16e   : > { %v5430_v5 = vadd.f32 %v3545_v19, %v3544_v7  ;;  %v3547_v25 = vpop.f32.mrb[42].mxu1 }
 0x16f   : > { %v3548_v26 = vpop.f32.mrb[43].mxu1 }
 0x170   : > { %v5432_v33 = vadd.f32 %v3548_v26, %v3547_v25 }
 0x171   : > { %v3438_v49 = vpop.f32.mrb[44].mxu0 }
 0x172   : > { %v3439_v9 = vpop.f32.mrb[45].mxu0 }
 0x173   : > { %v3440_v63 = vadd.f32 %v3439_v9, %v3438_v49  ;;  %v3441_v40 = vpop.f32.mrb[46].mxu0 }
 0x174   : > { %v3550_v1 = vpop.f32.mrb[44].mxu1  ;;  %v3442_v22 = vpop.f32.mrb[47].mxu0 }
 0x175   : > { %v3551_v11 = vpop.f32.mrb[45].mxu1  ;;  %v3443_v43 = vadd.f32 %v3442_v22, %v3441_v40 }
 0x176   : > { %v5434_v13 = vadd.f32 %v3551_v11, %v3550_v1  ;;  %v3553_v12 = vpop.f32.mrb[46].mxu1 }
 0x177   : > { %v3554_v24 = vpop.f32.mrb[47].mxu1 }
 0x178   : > { %v5436_v29 = vadd.f32 %v3554_v24, %v3553_v12 }
 0x179   : > { %v3444_v50 = vpop.f32.mrb[48].mxu0 }
 0x17a   : > { %v3445_v47 = vpop.f32.mrb[49].mxu0 }
 0x17b   : > { %v5438_v17 = vadd.f32 %v3445_v47, %v3444_v50  ;;  %v3447_v59 = vpop.f32.mrb[50].mxu0 }
 0x17c   : > { %v3556_v53 = vpop.f32.mrb[48].mxu1  ;;  %v3448_v32 = vpop.f32.mrb[51].mxu0 }
 0x17d   : > { %v3557_v39 = vpop.f32.mrb[49].mxu1  ;;  %v5440_v31 = vadd.f32 %v3448_v32, %v3447_v59 }
 0x17e   : > { %v3558_v42 = vadd.f32 %v3557_v39, %v3556_v53  ;;  %v3559_v41 = vpop.f32.mrb[50].mxu1 }
 0x17f   : > { %v3560_v7 = vpop.f32.mrb[51].mxu1 }
 0x180   : > { %v5442_v45 = vadd.f32 %v3558_v42, %v3422_v61  ;;  %v3561_v19 = vadd.f32 %v3560_v7, %v3559_v41 }
 0x181   : > { %v3450_v25 = vpop.f32.mrb[52].mxu0 }
 0x182   : > { %v5444_v2 = vadd.f32 %v3561_v19, %v3425_v44  ;;  %v3451_v26 = vpop.f32.mrb[53].mxu0 }
 0x183   : > { %v5446_v9 = vadd.f32 %v3451_v26, %v3450_v25  ;;  %v3453_v1 = vpop.f32.mrb[54].mxu0 }
 0x184   : > { %v3562_v49 = vpop.f32.mrb[52].mxu1  ;;  %v3454_v11 = vpop.f32.mrb[55].mxu0 }
 0x185   : > { %v3563_v40 = vpop.f32.mrb[53].mxu1  ;;  %v5448_v24 = vadd.f32 %v3454_v11, %v3453_v1 }
 0x186   : > { %v3564_v22 = vadd.f32 %v3563_v40, %v3562_v49  ;;  %v3565_v12 = vpop.f32.mrb[54].mxu1 }
 0x187   : > { %v3566_v50 = vpop.f32.mrb[55].mxu1 }
 0x188   : > { %v5450_v47 = vadd.f32 %v3564_v22, %v3428_v56  ;;  %v3567_v61 = vadd.f32 %v3566_v50, %v3565_v12 }
 0x189   : > { %v3456_v44 = vpop.f32.mrb[56].mxu0 }
 0x18a   : > { %v5452_v53 = vadd.f32 %v3567_v61, %v3431_v16  ;;  %v3457_v59 = vpop.f32.mrb[57].mxu0 }
 0x18b   : > { %v5454_v32 = vadd.f32 %v3457_v59, %v3456_v44  ;;  %v3459_v42 = vpop.f32.mrb[58].mxu0 }
 0x18c   : > { %5772 = vst [vmem:[#allocation8_spill] sm:$0xff] %v5452_v53  ;;  %v3568_v39 = vpop.f32.mrb[56].mxu1  ;;  %v3460_v7 = vpop.f32.mrb[59].mxu0 }
 0x18d   : > { %v3569_v41 = vpop.f32.mrb[57].mxu1  ;;  %v5456_v26 = vadd.f32 %v3460_v7, %v3459_v42 }
 0x18e   : > { %v3570_v19 = vadd.f32 %v3569_v41, %v3568_v39  ;;  %v3571_v25 = vpop.f32.mrb[58].mxu1 }
 0x18f   : > { %v3572_v49 = vpop.f32.mrb[59].mxu1 }
 0x190   : > { %v5458_v1 = vadd.f32 %v3570_v19, %v3434_v27  ;;  %v3573_v56 = vadd.f32 %v3572_v49, %v3571_v25 }
 0x191   : > { %v3462_v16 = vpop.f32.mrb[60].mxu0 }
 0x192   : > { %v5460_v40 = vadd.f32 %v3573_v56, %v3437_v38  ;;  %v3463_v11 = vpop.f32.mrb[61].mxu0 }
 0x193   : > { %v5462_v12 = vadd.f32 %v3463_v11, %v3462_v16  ;;  %v3465_v50 = vpop.f32.mrb[62].mxu0 }
 0x194   : > { %v3574_v22 = vpop.f32.mrb[60].mxu1  ;;  %v3466_v44 = vpop.f32.mrb[63].mxu0 }
 0x195   : > { %v3575_v61 = vpop.f32.mrb[61].mxu1  ;;  %v5464_v39 = vadd.f32 %v3466_v44, %v3465_v50 }
 0x196   : > { %v3576_v59 = vadd.f32 %v3575_v61, %v3574_v22  ;;  %v3577_v53 = vpop.f32.mrb[62].mxu1 }
 0x197   : > { %v3578_v42 = vpop.f32.mrb[63].mxu1 }
 0x198   : > { %v5466_v41 = vadd.f32 %v3576_v59, %v3440_v63  ;;  %v3579_v27 = vadd.f32 %v3578_v42, %v3577_v53 }
 0x199   : > { %v3782_v38 = vpop.f32.mrb[64].mxu0 }
 0x19a   : > { %v5468_v7 = vadd.f32 %v3579_v27, %v3443_v43  ;;  %v1342_v19 = vadd.f32 %v3782_v38, %v5281_v52  ;;  %v1333_v25 = vpop.f32.mrb[65].mxu0 }
 0x19b   : > { %v1334_v56 = vadd.f32 %v5273_v23, %v1333_v25  ;;  %v3783_v16 = vpop.f32.mrb[66].mxu0 }
 0x19c   : > { %v3580_v49 = vpop.f32.mrb[64].mxu1  ;;  %v5473_v11 = vadd.f32 %v5377_v37, %v1342_v19  ;;  %v1345_v50 = vadd.f32 %v3783_v16, %v5284_v30  ;;  %v1336_v61 = vpop.f32.mrb[67].mxu0 }
 0x19d   : > { %v3581_v22 = vpop.f32.mrb[65].mxu1  ;;  %v5477_v63 = vadd.f32 %v5358_v15, %v1334_v56  ;;  %v1337_v44 = vadd.f32 %v5275_v20, %v1336_v61 }
 0x19e   : > { %v3582_v43 = vadd.f32 %v3581_v22, %v3580_v49  ;;  %v3583_v53 = vpop.f32.mrb[66].mxu1  ;;  %v5481_v52 = vadd.f32 %v5382_v35, %v1345_v50 }
 0x19f   : > { %v3584_v59 = vpop.f32.mrb[67].mxu1  ;;  %v5487_v37 = vadd.f32 %v5363_v54, %v1337_v44 }
 0x1a0   : > { %v5484_v23 = vadd.f32 %v3582_v43, %v5438_v17  ;;  %v3585_v42 = vadd.f32 %v3584_v59, %v3583_v53 }
 0x1a1   : > { %v3786_v15 = vpop.f32.mrb[68].mxu0 }
 0x1a2   : > { %v5490_v30 = vadd.f32 %v3585_v42, %v5440_v31  ;;  %v1358_v27 = vadd.f32 %v3786_v15, %v5327_v10  ;;  %v1349_v38 = vpop.f32.mrb[69].mxu0 }
 0x1a3   : > { %v1350_v20 = vadd.f32 %v5305_v21, %v1349_v38  ;;  %v3787_v35 = vpop.f32.mrb[70].mxu0 }
 0x1a4   : > { %v3586_v19 = vpop.f32.mrb[68].mxu1  ;;  %v5495_v25 = vadd.f32 %v5411_v3, %v1358_v27  ;;  %v1361_v49 = vadd.f32 %v3787_v35, %v5331_v51  ;;  %v1352_v54 = vpop.f32.mrb[71].mxu0 }
 0x1a5   : > { %v3587_v17 = vpop.f32.mrb[69].mxu1  ;;  %v5499_v56 = vadd.f32 %v5395_v57, %v1350_v20  ;;  %v1353_v22 = vadd.f32 %v5307_v48, %v1352_v54 }
 0x1a6   : > { %v3588_v31 = vadd.f32 %v3587_v17, %v3586_v19  ;;  %v3589_v16 = vpop.f32.mrb[70].mxu1  ;;  %v5503_v10 = vadd.f32 %v5416_v55, %v1361_v49 }
 0x1a7   : > { %v3590_v50 = vpop.f32.mrb[71].mxu1  ;;  %v5509_v3 = vadd.f32 %v5400_v46, %v1353_v22 }
 0x1a8   : > { %v5506_v21 = vadd.f32 %v3588_v31, %v5446_v9  ;;  %v3591_v61 = vadd.f32 %v3590_v50, %v3589_v16 }
 0x1a9   : > { %v3790_v57 = vpop.f32.mrb[72].mxu0 }
 0x1aa   : > { %v5512_v51 = vadd.f32 %v3591_v61, %v5448_v24  ;;  %v1374_v43 = vadd.f32 %v3790_v57, %v5373_v18  ;;  %v1365_v53 = vpop.f32.mrb[73].mxu0 }
 0x1ab   : > { %v1366_v48 = vadd.f32 %v5352_v14, %v1365_v53  ;;  %v3791_v55 = vpop.f32.mrb[74].mxu0 }
 0x1ac   : > { %v3592_v44 = vpop.f32.mrb[72].mxu1  ;;  %v5517_v59 = vadd.f32 %v5426_v6, %v1374_v43  ;;  %v1377_v42 = vadd.f32 %v3791_v55, %v5379_v36  ;;  %v1368_v46 = vpop.f32.mrb[75].mxu0 }
 0x1ad   : > { %v3593_v9 = vpop.f32.mrb[73].mxu1  ;;  %v5521_v15 = vadd.f32 %v5422_v28, %v1366_v48  ;;  %v1369_v38 = vadd.f32 %v5360_v62, %v1368_v46 }
 0x1ae   : > { %v3594_v24 = vadd.f32 %v3593_v9, %v3592_v44  ;;  %v3595_v27 = vpop.f32.mrb[74].mxu1  ;;  %v5525_v18 = vadd.f32 %v5428_v4, %v1377_v42 }
 0x1af   : > { %v3596_v19 = vpop.f32.mrb[75].mxu1  ;;  %v1674_v6 = vadd.f32 %v5424_v58, %v1369_v38 }
 0x1b0   : > { %v5528_v14 = vadd.f32 %v3594_v24, %v5454_v32  ;;  %v3597_v20 = vadd.f32 %v3596_v19, %v3595_v27 }
 0x1b1   : > { %v3794_v35 = vpop.f32.mrb[76].mxu0 }
 0x1b2   : > { %v5532_v36 = vadd.f32 %v3597_v20, %v5456_v26  ;;  %v1390_v28 = vadd.f32 %v3794_v35, %v5408_v60  ;;  %v1381_v17 = vpop.f32.mrb[77].mxu0 }
 0x1b3   : > { %v1382_v62 = vadd.f32 %v5391_v0, %v1381_v17  ;;  %v3795_v54 = vpop.f32.mrb[78].mxu0 }
 0x1b4   : > { %v3598_v49 = vpop.f32.mrb[76].mxu1  ;;  %v5537_v4 = vadd.f32 %v5434_v13, %v1390_v28  ;;  %v1393_v32 = vadd.f32 %v3795_v54, %v5413_v34  ;;  %v1384_v16 = vpop.f32.mrb[79].mxu0 }
 0x1b5   : > { %v3599_v31 = vpop.f32.mrb[77].mxu1  ;;  %v5541_v58 = vadd.f32 %v5430_v5, %v1382_v62  ;;  %v1385_v50 = vadd.f32 %v5397_v8, %v1384_v16 }
 0x1b6   : > { %v3600_v26 = vadd.f32 %v3599_v31, %v3598_v49  ;;  %v3601_v22 = vpop.f32.mrb[78].mxu1  ;;  %v5545_v60 = vadd.f32 %v5436_v29, %v1393_v32 }
 0x1b7   : > { %v3602_v61 = vpop.f32.mrb[79].mxu1  ;;  %v1690_v13 = vadd.f32 %v5432_v33, %v1385_v50 }
 0x1b8   : > { %v5548_v0 = vadd.f32 %v3600_v26, %v5462_v12  ;;  %v3603_v57 = vadd.f32 %v3602_v61, %v3601_v22 }
 0x1b9   : > { %v3644_v43 = vpop.f32.mrb[80].mxu0 }
 0x1ba   : > { %v5552_v34 = vadd.f32 %v3603_v57, %v5464_v39  ;;  %v3645_v5 = vpop.f32.mrb[81].mxu0 }
 0x1bb   : > { %v3646_v53 = vadd.f32 %v3645_v5, %v3644_v43  ;;  %v3647_v44 = vpop.f32.mrb[82].mxu0 }
 0x1bc   : > { %v3648_v48 = vpop.f32.mrb[83].mxu0 }
 0x1bd   : > { %v3649_v55 = vadd.f32 %v3648_v48, %v3647_v44  ;;  %v5555_v8 = vadd.f32 %v3646_v53, %v5477_v63 }
 0x1bf   : > { %v5558_v29 = vadd.f32 %v3649_v55, %v5487_v37 }
 0x1c1   : > { %v3650_v12 = vpop.f32.mrb[84].mxu0 }
 0x1c2   : > { %v3651_v9 = vpop.f32.mrb[85].mxu0 }
 0x1c3   : > { %v3652_v42 = vadd.f32 %v3651_v9, %v3650_v12  ;;  %v3653_v33 = vpop.f32.mrb[86].mxu0 }
 0x1c4   : > { %v3654_v46 = vpop.f32.mrb[87].mxu0 }
 0x1c5   : > { %v3655_v24 = vadd.f32 %v3654_v46, %v3653_v33  ;;  %v3926_v39 = vadd.f32 %v3652_v42, %v5473_v11 }
 0x1c7   : > { %v5562_v27 = vadd.f32 %v3655_v24, %v5481_v52 }
 0x1c9   : > { %v3656_v38 = vpop.f32.mrb[88].mxu0 }
 0x1ca   : > { %v3657_v19 = vpop.f32.mrb[89].mxu0 }
 0x1cb   : > { %v3658_v20 = vadd.f32 %v3657_v19, %v3656_v38  ;;  %v3659_v35 = vpop.f32.mrb[90].mxu0 }
 0x1cc   : > { %v3660_v63 = vpop.f32.mrb[91].mxu0 }
 0x1cd   : > { %v3661_v28 = vadd.f32 %v3660_v63, %v3659_v35  ;;  %v5565_v37 = vadd.f32 %v3658_v20, %v5499_v56 }
 0x1cf   : > { %v5568_v17 = vadd.f32 %v3661_v28, %v5509_v3 }
 0x1d1   : > { %v3662_v49 = vpop.f32.mrb[92].mxu0 }
 0x1d2   : > { %v3663_v62 = vpop.f32.mrb[93].mxu0 }
 0x1d3   : > { %v3664_v54 = vadd.f32 %v3663_v62, %v3662_v49  ;;  %v3665_v31 = vpop.f32.mrb[94].mxu0 }
 0x1d4   : > { %v3666_v11 = vpop.f32.mrb[95].mxu0 }
 0x1d5   : > { %v3667_v32 = vadd.f32 %v3666_v11, %v3665_v31  ;;  %v5571_v52 = vadd.f32 %v3664_v54, %v5495_v25 }
 0x1d7   : > { %v5574_v16 = vadd.f32 %v3667_v32, %v5503_v10 }
 0x1d9   : > { %v3668_v26 = vpop.f32.mrb[96].mxu0 }
 0x1da   : > { %v3669_v22 = vpop.f32.mrb[97].mxu0 }
 0x1db   : > { %v3670_v50 = vadd.f32 %v3669_v22, %v3668_v26  ;;  %v3671_v56 = vpop.f32.mrb[98].mxu0 }
 0x1dc   : > { %v3672_v61 = vpop.f32.mrb[99].mxu0 }
 0x1dd   : > { %v3673_v57 = vadd.f32 %v3672_v61, %v3671_v56  ;;  %v5577_v3 = vadd.f32 %v3670_v50, %v5521_v15 }
 0x1df   : > { %v5579_v43 = vadd.f32 %v3673_v57, %v1674_v6 }
 0x1e1   : > { %v3674_v5 = vpop.f32.mrb[100].mxu0 }
 0x1e2   : > { %v3675_v53 = vpop.f32.mrb[101].mxu0 }
 0x1e3   : > { %v3676_v44 = vadd.f32 %v3675_v53, %v3674_v5  ;;  %v3677_v48 = vpop.f32.mrb[102].mxu0 }
 0x1e4   : > { %v3678_v25 = vpop.f32.mrb[103].mxu0 }
 0x1e5   : > { %v3679_v55 = vadd.f32 %v3678_v25, %v3677_v48  ;;  %v5582_v10 = vadd.f32 %v3676_v44, %v5517_v59 }
 0x1e7   : > { %v5585_v12 = vadd.f32 %v3679_v55, %v5525_v18 }
 0x1e9   : > { %v3680_v9 = vpop.f32.mrb[104].mxu0 }
 0x1ea   : > { %v3681_v42 = vpop.f32.mrb[105].mxu0 }
 0x1eb   : > { %v3682_v33 = vadd.f32 %v3681_v42, %v3680_v9  ;;  %v3683_v15 = vpop.f32.mrb[106].mxu0 }
 0x1ec   : > { %v3684_v46 = vpop.f32.mrb[107].mxu0 }
 0x1ed   : > { %v3685_v6 = vadd.f32 %v3684_v46, %v3683_v15  ;;  %v5588_v24 = vadd.f32 %v3682_v33, %v5541_v58 }
 0x1ef   : > { %v5590_v38 = vadd.f32 %v3685_v6, %v1690_v13 }
 0x1f1   : > { %v3686_v19 = vpop.f32.mrb[108].mxu0 }
 0x1f2   : > { %v3687_v20 = vpop.f32.mrb[109].mxu0 }
 0x1f3   : > { %v3688_v35 = vadd.f32 %v3687_v20, %v3686_v19  ;;  %v3689_v59 = vpop.f32.mrb[110].mxu0 }
 0x1f4   : > { %v3690_v63 = vpop.f32.mrb[111].mxu0 }
 0x1f5   : > { %v3691_v28 = vadd.f32 %v3690_v63, %v3689_v59  ;;  %v5593_v18 = vadd.f32 %v3688_v35, %v5537_v4 }
 0x1f7   : > { %v5596_v49 = vadd.f32 %v3691_v28, %v5545_v60 }
 0x1f9   : > { %v3692_v62 = vpop.f32.mrb[112].mxu0 }
 0x1fa   : > { %v3693_v58 = vpop.f32.mrb[113].mxu0 }
 0x1fb   : > { %v3694_v13 = vadd.f32 %v3693_v58, %v3692_v62  ;;  %v3695_v31 = vpop.f32.mrb[114].mxu0 }
 0x1fc   : > { %v3878_v54 = vpop.f32.mrb[80].mxu1  ;;  %v3696_v26 = vpop.f32.mrb[115].mxu0 }
 0x1fd   : > { %v3927_v11 = vadd.f32 %v3926_v39, %v3878_v54  ;;  %v2484_v32 = vpop.f32.mrb[81].mxu1  ;;  %v3697_v4 = vadd.f32 %v3696_v26, %v3695_v31  ;;  %v5604_v56 = vadd.f32 %v5442_v45, %v3694_v13 }
 0x1fe   : > { %v3931_v22 = vadd.f32 %v5555_v8, %v2484_v32  ;;  %v3879_v50 = vpop.f32.mrb[82].mxu1  ;;  %v5773_v32 = vld [vmem:[#allocation8_spill] sm:$0xff] }
 0x1ff   : > { %v3935_v60 = vadd.f32 %v5562_v27, %v3879_v50  ;;  %v2487_v61 = vpop.f32.mrb[83].mxu1  ;;  %v5609_v5 = vadd.f32 %v5444_v2, %v3697_v4  ;;  %v2842_v8 = vmul.f32 %v3927_v11, %v3927_v11 }
 0x200   : > { %v3939_v57 = vadd.f32 %v5558_v29, %v2487_v61  ;;  %v2840_v39 = vmul.f32 %v3931_v22, %v3931_v22 }
 0x201   : > { %v3269_v53 = vpack.c.bf16 %v3935_v60, %v3927_v11  ;;  %v3698_v55 = vpop.f32.mrb[116].mxu0  ;;  %v2843_v33 = vmul.f32 %v3935_v60, %v3935_v60 }
 0x202   : > { %v3264_v44 = vpack.c.bf16 %v3939_v57, %v3931_v22  ;;  %v2803_v48 = vadd.f32 %v3939_v57, %v3931_v22  ;;  %v2841_v25 = vmul.f32 %v3939_v57, %v3939_v57  ;;  %v3699_v45 = vpop.f32.mrb[117].mxu0 }
 0x203   : > { %3341 = vst [vmem:[%s5611_s9 + $0x8] sm:$0xff] %v3269_v53   ;;  %v3700_v42 = vadd.f32 %v3699_v45, %v3698_v55  ;;  %v3701_v2 = vpop.f32.mrb[118].mxu0 }
 0x204   : > { %3265 = vst [vmem:[%s5611_s9] sm:$0xff] %v3264_v44   ;;  %v2804_v27 = vadd.f32 %v3927_v11, %v2803_v48  ;;  %v2872_v9 = vadd.f32 %v2841_v25, %v2840_v39  ;;  %v3882_v29 = vpop.f32.mrb[84].mxu1  ;;  %v3702_v6 = vpop.f32.mrb[119].mxu0 }
 0x205   : > { %v3943_v15 = vadd.f32 %v5571_v52, %v3882_v29  ;;  %v2500_v46 = vpop.f32.mrb[85].mxu1  ;;  %v3703_v63 = vadd.f32 %v3702_v6, %v3701_v2  ;;  %v5619_v58 = vadd.f32 %v5450_v47, %v3700_v42 }
 0x206   : > { %v2873_v19 = vadd.f32 %v2872_v9, %v2842_v8  ;;  %v3947_v20 = vadd.f32 %v5565_v37, %v2500_v46  ;;  %v2805_v35 = vadd.f32 %v3935_v60, %v2804_v27  ;;  %v3883_v59 = vpop.f32.mrb[86].mxu1 }
 0x207   : > { %v3951_v28 = vadd.f32 %v5574_v16, %v3883_v59  ;;  %v2503_v62 = vpop.f32.mrb[87].mxu1  ;;  %v5623_v26 = vadd.f32 %v5773_v32, %v3703_v63  ;;  %v2846_v61 = vmul.f32 %v3943_v15, %v3943_v15 }
 0x208   : > { %v2806_v54 = vadd.f32 %v3947_v20, %v2805_v35  ;;  %v2844_v13 = vmul.f32 %v3947_v20, %v3947_v20  ;;  %v2874_v31 = vadd.f32 %v2873_v19, %v2843_v33  ;;  %v3955_v52 = vadd.f32 %v5568_v17, %v2503_v62 }
 0x209   : > { %v3279_v11 = vpack.c.bf16 %v3951_v28, %v3943_v15  ;;  %v3704_v60 = vpop.f32.mrb[120].mxu0  ;;  %v2847_v48 = vmul.f32 %v3951_v28, %v3951_v28 }
 0x20a   : > { %v2875_v37 = vadd.f32 %v2874_v31, %v2844_v13  ;;  %v3274_v22 = vpack.c.bf16 %v3955_v52, %v3947_v20  ;;  %v2807_v50 = vadd.f32 %v3955_v52, %v2806_v54  ;;  %v2845_v4 = vmul.f32 %v3955_v52, %v3955_v52  ;;  %v3705_v16 = vpop.f32.mrb[121].mxu0 }
 0x20b   : > { %3343 = vst [vmem:[%s5611_s9 + $0x18] sm:$0xff] %v3279_v11   ;;  %v3706_v39 = vadd.f32 %v3705_v16, %v3704_v60  ;;  %v3707_v44 = vpop.f32.mrb[122].mxu0 }
 0x20c   : > { %3342 = vst [vmem:[%s5611_s9 + $0x10] sm:$0xff] %v3274_v22   ;;  %v2808_v47 = vadd.f32 %v3943_v15, %v2807_v50  ;;  %v2876_v57 = vadd.f32 %v2875_v37, %v2845_v4  ;;  %v3886_v53 = vpop.f32.mrb[88].mxu1  ;;  %v3708_v55 = vpop.f32.mrb[123].mxu0 }
 0x20d   : > { %v3959_v17 = vadd.f32 %v5582_v10, %v3886_v53  ;;  %v2516_v25 = vpop.f32.mrb[89].mxu1  ;;  %v3709_v29 = vadd.f32 %v3708_v55, %v3707_v44  ;;  %v5631_v33 = vadd.f32 %v5458_v1, %v3706_v39 }
 0x20e   : > { %v2877_v45 = vadd.f32 %v2876_v57, %v2846_v61  ;;  %v3963_v8 = vadd.f32 %v5577_v3, %v2516_v25  ;;  %v2809_v27 = vadd.f32 %v3951_v28, %v2808_v47  ;;  %v3887_v9 = vpop.f32.mrb[90].mxu1 }
 0x20f   : > { %v3967_v42 = vadd.f32 %v5585_v12, %v3887_v9  ;;  %v2519_v2 = vpop.f32.mrb[91].mxu1  ;;  %v5635_v20 = vadd.f32 %v5460_v40, %v3709_v29  ;;  %v2850_v62 = vmul.f32 %v3959_v17, %v3959_v17 }
 0x210   : > { %v2810_v15 = vadd.f32 %v3963_v8, %v2809_v27  ;;  %v2848_v46 = vmul.f32 %v3963_v8, %v3963_v8  ;;  %v2878_v6 = vadd.f32 %v2877_v45, %v2847_v48  ;;  %v3971_v10 = vadd.f32 %v5579_v43, %v2519_v2 }
 0x211   : > { %v3289_v19 = vpack.c.bf16 %v3967_v42, %v3959_v17  ;;  %v3710_v28 = vpop.f32.mrb[124].mxu0  ;;  %v2851_v11 = vmul.f32 %v3967_v42, %v3967_v42 }
 0x212   : > { %v2879_v3 = vadd.f32 %v2878_v6, %v2848_v46  ;;  %v3284_v35 = vpack.c.bf16 %v3971_v10, %v3963_v8  ;;  %v2811_v59 = vadd.f32 %v3971_v10, %v2810_v15  ;;  %v2849_v63 = vmul.f32 %v3971_v10, %v3971_v10  ;;  %v3711_v12 = vpop.f32.mrb[125].mxu0 }
 0x213   : > { %3345 = vst [vmem:[%s5611_s9 + $0x28] sm:$0xff] %v3289_v19   ;;  %v3712_v31 = vadd.f32 %v3711_v12, %v3710_v28  ;;  %v3713_v52 = vpop.f32.mrb[126].mxu0 }
 0x214   : > { %3344 = vst [vmem:[%s5611_s9 + $0x20] sm:$0xff] %v3284_v35   ;;  %v2812_v1 = vadd.f32 %v3959_v17, %v2811_v59  ;;  %v2880_v54 = vadd.f32 %v2879_v3, %v2849_v63  ;;  %v3890_v13 = vpop.f32.mrb[92].mxu1  ;;  %v3714_v40 = vpop.f32.mrb[127].mxu0 }
 0x215   : > { %v3975_v43 = vadd.f32 %v5593_v18, %v3890_v13  ;;  %v2532_v32 = vpop.f32.mrb[93].mxu1  ;;  %v3715_v60 = vadd.f32 %v3714_v40, %v3713_v52  ;;  %v4001_v47 = vadd.f32 %v5466_v41, %v3712_v31 }
 0x216   : > { %v2881_v37 = vadd.f32 %v2880_v54, %v2850_v62  ;;  %v3979_v22 = vadd.f32 %v5588_v24, %v2532_v32  ;;  %v2813_v50 = vadd.f32 %v3967_v42, %v2812_v1  ;;  %v3891_v4 = vpop.f32.mrb[94].mxu1 }
 0x217   : > { %v3983_v16 = vadd.f32 %v5596_v49, %v3891_v4  ;;  %v2535_v61 = vpop.f32.mrb[95].mxu1  ;;  %v4007_v48 = vadd.f32 %v5468_v7, %v3715_v60  ;;  %v2854_v49 = vmul.f32 %v3975_v43, %v3975_v43 }
 0x218   : > { %v2814_v57 = vadd.f32 %v3979_v22, %v2813_v50  ;;  %v2852_v53 = vmul.f32 %v3979_v22, %v3979_v22  ;;  %v2882_v39 = vadd.f32 %v2881_v37, %v2851_v11  ;;  %v3987_v18 = vadd.f32 %v5590_v38, %v2535_v61 }
 0x219   : > { %v3299_v44 = vpack.c.bf16 %v3983_v16, %v3975_v43  ;;  %v3716_v45 = vpop.f32.mrb[128].mxu0  ;;  %v2855_v2 = vmul.f32 %v3983_v16, %v3983_v16 }
 0x21a   : > { %v2883_v17 = vadd.f32 %v2882_v39, %v2852_v53  ;;  %v3294_v24 = vpack.c.bf16 %v3987_v18, %v3979_v22  ;;  %v2815_v25 = vadd.f32 %v3987_v18, %v2814_v57  ;;  %v2853_v55 = vmul.f32 %v3987_v18, %v3987_v18  ;;  %v3717_v8 = vpop.f32.mrb[129].mxu0 }
 0x21b   : > { %3347 = vst [vmem:[%s5611_s9 + $0x38] sm:$0xff] %v3299_v44   ;;  %v3718_v29 = vadd.f32 %v3717_v8, %v3716_v45  ;;  %v3719_v42 = vpop.f32.mrb[130].mxu0 }
 0x21c   : > { %3346 = vst [vmem:[%s5611_s9 + $0x30] sm:$0xff] %v3294_v24   ;;  %v2816_v27 = vadd.f32 %v3975_v43, %v2815_v25  ;;  %v2884_v9 = vadd.f32 %v2883_v17, %v2853_v55  ;;  %v3894_v41 = vpop.f32.mrb[0].mxu1  ;;  %v3720_v46 = vpop.f32.mrb[131].mxu0 }
 0x21d   : > { %v3990_v38 = vadd.f32 %v5619_v58, %v3894_v41  ;;  %v2548_v15 = vpop.f32.mrb[1].mxu1  ;;  %v3721_v3 = vadd.f32 %v3720_v46, %v3719_v42  ;;  %v4016_v63 = vadd.f32 %v5484_v23, %v3718_v29 }
 0x21e   : > { %v2885_v7 = vadd.f32 %v2884_v9, %v2854_v49  ;;  %v3993_v6 = vadd.f32 %v5604_v56, %v2548_v15  ;;  %v2817_v10 = vadd.f32 %v3983_v16, %v2816_v27  ;;  %v3895_v19 = vpop.f32.mrb[2].mxu1 }
 0x21f   : > { %v3996_v35 = vadd.f32 %v5623_v26, %v3895_v19  ;;  %v2551_v59 = vpop.f32.mrb[3].mxu1  ;;  %v4022_v54 = vadd.f32 %v5490_v30, %v3721_v3  ;;  %v2858_v26 = vmul.f32 %v3990_v38, %v3990_v38 }
 0x220   : > { %v2818_v28 = vadd.f32 %v3993_v6, %v2817_v10  ;;  %v2856_v12 = vmul.f32 %v3993_v6, %v3993_v6  ;;  %v2886_v62 = vadd.f32 %v2885_v7, %v2855_v2  ;;  %v3999_v58 = vadd.f32 %v5609_v5, %v2551_v59 }
 0x221   : > { %v3309_v1 = vpack.c.bf16 %v3996_v35, %v3990_v38  ;;  %v3722_v11 = vpop.f32.mrb[132].mxu0  ;;  %v2859_v50 = vmul.f32 %v3996_v35, %v3996_v35 }
 0x222   : > { %v2887_v13 = vadd.f32 %v2886_v62, %v2856_v12  ;;  %v3304_v56 = vpack.c.bf16 %v3999_v58, %v3993_v6  ;;  %v2819_v31 = vadd.f32 %v3999_v58, %v2818_v28  ;;  %v2857_v52 = vmul.f32 %v3999_v58, %v3999_v58  ;;  %v3723_v43 = vpop.f32.mrb[133].mxu0 }
 0x223   : > { %3349 = vst [vmem:[%s5611_s9 + $0x48] sm:$0xff] %v3309_v1   ;;  %v3724_v37 = vadd.f32 %v3723_v43, %v3722_v11  ;;  %v3725_v22 = vpop.f32.mrb[134].mxu0 }
 0x224   : > { %3348 = vst [vmem:[%s5611_s9 + $0x40] sm:$0xff] %v3304_v56   ;;  %v2820_v32 = vadd.f32 %v3990_v38, %v2819_v31  ;;  %v2888_v40 = vadd.f32 %v2887_v13, %v2857_v52  ;;  %v3898_v23 = vpop.f32.mrb[4].mxu1  ;;  %v3726_v60 = vpop.f32.mrb[135].mxu0 }
 0x225   : > { %v4002_v4 = vadd.f32 %v4001_v47, %v3898_v23  ;;  %v2564_v5 = vpop.f32.mrb[5].mxu1  ;;  %v3727_v53 = vadd.f32 %v3726_v60, %v3725_v22  ;;  %v4013_v44 = vadd.f32 %v5506_v21, %v3724_v37 }
 0x226   : > { %v2889_v16 = vadd.f32 %v2888_v40, %v2858_v26  ;;  %v4005_v30 = vadd.f32 %v5631_v33, %v2564_v5  ;;  %v2821_v61 = vadd.f32 %v3996_v35, %v2820_v32  ;;  %v3899_v57 = vpop.f32.mrb[6].mxu1 }
 0x227   : > { %v4008_v39 = vadd.f32 %v4007_v48, %v3899_v57  ;;  %v2567_v18 = vpop.f32.mrb[7].mxu1  ;;  %v4019_v45 = vadd.f32 %v5512_v51, %v3727_v53  ;;  %v2862_v48 = vmul.f32 %v4002_v4, %v4002_v4 }
 0x228   : > { %v2822_v17 = vadd.f32 %v4005_v30, %v2821_v61  ;;  %v2860_v24 = vmul.f32 %v4005_v30, %v4005_v30  ;;  %v2890_v25 = vadd.f32 %v2889_v16, %v2859_v50  ;;  %v4011_v55 = vadd.f32 %v5635_v20, %v2567_v18 }
 0x229   : > { %v3319_v47 = vpack.c.bf16 %v4008_v39, %v4002_v4  ;;  %v3728_v9 = vpop.f32.mrb[136].mxu0  ;;  %v2863_v15 = vmul.f32 %v4008_v39, %v4008_v39 }
 0x22a   : > { %v2891_v8 = vadd.f32 %v2890_v25, %v2860_v24  ;;  %v3314_v49 = vpack.c.bf16 %v4011_v55, %v4005_v30  ;;  %v2823_v33 = vadd.f32 %v4011_v55, %v2822_v17  ;;  %v2861_v27 = vmul.f32 %v4011_v55, %v4011_v55  ;;  %v3729_v41 = vpop.f32.mrb[137].mxu0 }
 0x22b   : > { %3351 = vst [vmem:[%s5611_s9 + $0x58] sm:$0xff] %v3319_v47   ;;  %v3730_v2 = vadd.f32 %v3729_v41, %v3728_v9  ;;  %v3731_v38 = vpop.f32.mrb[138].mxu0 }
 0x22c   : > { %3350 = vst [vmem:[%s5611_s9 + $0x50] sm:$0xff] %v3314_v49   ;;  %v2824_v29 = vadd.f32 %v4002_v4, %v2823_v33  ;;  %v2892_v42 = vadd.f32 %v2891_v8, %v2861_v27  ;;  %v3902_v21 = vpop.f32.mrb[8].mxu1  ;;  %v3732_v7 = vpop.f32.mrb[139].mxu0 }
 0x22d   : > { %v4014_v46 = vadd.f32 %v4013_v44, %v3902_v21  ;;  %v2580_v20 = vpop.f32.mrb[9].mxu1  ;;  %v3733_v3 = vadd.f32 %v3732_v7, %v3731_v38  ;;  %v4028_v28 = vadd.f32 %v5528_v14, %v3730_v2 }
 0x22e   : > { %v2893_v6 = vadd.f32 %v2892_v42, %v2862_v48  ;;  %v4017_v51 = vadd.f32 %v4016_v63, %v2580_v20  ;;  %v2825_v10 = vadd.f32 %v4008_v39, %v2824_v29  ;;  %v3903_v19 = vpop.f32.mrb[10].mxu1 }
 0x22f   : > { %v4020_v35 = vadd.f32 %v4019_v45, %v3903_v19  ;;  %v2583_v59 = vpop.f32.mrb[11].mxu1  ;;  %v4034_v56 = vadd.f32 %v5532_v36, %v3733_v3  ;;  %v2866_v32 = vmul.f32 %v4014_v46, %v4014_v46 }
 0x230   : > { %v2826_v12 = vadd.f32 %v4017_v51, %v2825_v10  ;;  %v2864_v62 = vmul.f32 %v4017_v51, %v4017_v51  ;;  %v2894_v58 = vadd.f32 %v2893_v6, %v2863_v15  ;;  %v4023_v1 = vadd.f32 %v4022_v54, %v2583_v59 }
 0x231   : > { %v3329_v13 = vpack.c.bf16 %v4020_v35, %v4014_v46  ;;  %v3734_v43 = vpop.f32.mrb[140].mxu0  ;;  %v2867_v50 = vmul.f32 %v4020_v35, %v4020_v35 }
 0x232   : > { %v2895_v31 = vadd.f32 %v2894_v58, %v2864_v62  ;;  %v3324_v52 = vpack.c.bf16 %v4023_v1, %v4017_v51  ;;  %v2827_v11 = vadd.f32 %v4023_v1, %v2826_v12  ;;  %v2865_v63 = vmul.f32 %v4023_v1, %v4023_v1  ;;  %v3735_v26 = vpop.f32.mrb[141].mxu0 }
 0x233   : > { %3353 = vst [vmem:[%s5611_s9 + $0x68] sm:$0xff] %v3329_v13   ;;  %v3736_v14 = vadd.f32 %v3735_v26, %v3734_v43  ;;  %v3737_v22 = vpop.f32.mrb[142].mxu0 }
 0x234   : > { %3352 = vst [vmem:[%s5611_s9 + $0x60] sm:$0xff] %v3324_v52   ;;  %v2828_v40 = vadd.f32 %v4014_v46, %v2827_v11  ;;  %v2896_v23 = vadd.f32 %v2895_v31, %v2865_v63  ;;  %v3906_v37 = vpop.f32.mrb[12].mxu1  ;;  %v3738_v4 = vpop.f32.mrb[143].mxu0 }
 0x235   : > { %v2596_v54 = vpop.f32.mrb[13].mxu1  ;;  %v4025_v5 = vadd.f32 %v5548_v0, %v3736_v14  ;;  %v3739_v61 = vadd.f32 %v3738_v4, %v3737_v22 }
 0x236   : > { %v2897_v36 = vadd.f32 %v2896_v23, %v2866_v32  ;;  %v4029_v60 = vadd.f32 %v4028_v28, %v2596_v54  ;;  %v2829_v16 = vadd.f32 %v4020_v35, %v2828_v40  ;;  %v3907_v30 = vpop.f32.mrb[14].mxu1 }
 0x237   : > { %v2599_v57 = vpop.f32.mrb[15].mxu1  ;;  %v4026_v53 = vadd.f32 %v4025_v5, %v3906_v37  ;;  %v4031_v17 = vadd.f32 %v5552_v34, %v3739_v61 }
 0x238   : > { %v2830_v39 = vadd.f32 %v4029_v60, %v2829_v16  ;;  %v2868_v18 = vmul.f32 %v4029_v60, %v4029_v60  ;;  %v2898_v44 = vadd.f32 %v2897_v36, %v2867_v50  ;;  %v4035_v24 = vadd.f32 %v4034_v56, %v2599_v57 }
 0x239   : > { %v2870_v25 = vmul.f32 %v4026_v53, %v4026_v53  ;;  %v4032_v0 = vadd.f32 %v4031_v17, %v3907_v30 }
 0x23a   : > { %v2899_v55 = vadd.f32 %v2898_v44, %v2868_v18  ;;  %v3334_v47 = vpack.c.bf16 %v4035_v24, %v4029_v60  ;;  %v2831_v45 = vadd.f32 %v4035_v24, %v2830_v39  ;;  %v2869_v8 = vmul.f32 %v4035_v24, %v4035_v24 }
 0x23b   : > { %v3339_v34 = vpack.c.bf16 %v4032_v0, %v4026_v53  ;;  %v2871_v49 = vmul.f32 %v4032_v0, %v4032_v0 }
 0x23c   : > { %3354 = vst [vmem:[%s5611_s9 + $0x70] sm:$0xff] %v3334_v47   ;;  %v2832_v33 = vadd.f32 %v4026_v53, %v2831_v45  ;;  %v2900_v27 = vadd.f32 %v2899_v55, %v2869_v8 }
 0x23d   : > { %3355 = vst [vmem:[%s5611_s9 + $0x78] sm:$0xff] %v3339_v34  }
 0x23e   : > { %v2833_v9 = vadd.f32 %v4032_v0, %v2832_v33  ;;  %v2901_v41 = vadd.f32 %v2900_v27, %v2870_v25 }
 0x23f   : > { %4267 = shalt.err (!%p4264_p3)
}
 0x240   : > { %s4268_s29 = scalar_lea.hbm %s5672_s20, 2048  ;;  %s4272_s6 = scalar_lea.hbm %s5752_s2, 4096 }
 0x241   : > { %p4269_p4 = scmp.ne.s32.totalorder %s5672_s20, %s4268_s29  ;;  %p4273_p9 = scmp.lt.u32.totalorder %s5672_s20, %s5752_s2 }
 0x242   : > { %p4274_p10 = scmp.lt.u32.totalorder %s4272_s6, %s4268_s29  ;;  %p4276_p12 = scmp.lt.u32.totalorder %s4268_s29, %s5672_s20 }
 0x243   : > { %p4270_p7 = pnand %p4269_p4, %p4412_p5 }
 0x244   : > { %p4275_p11 = por %p4274_p10, %p4273_p9 }
 0x245   : > { %p4271_p8 = pneg %p4270_p7 }
 0x246   : > { %p4277_p13 = por %p4276_p12, %p4275_p11 }
 0x248   : > { %p4278_p0 = pnand %p4277_p13, %p4271_p8 }
 0x24a   : > { %4281 = shalt.err (!%p4278_p0)
}
 0x24b   : > { %s4351_s9 = smov 64   ;;  %s4352_s10 = smov 4   ;;  %v2834_v48 = vrot.slane %v2833_v9, 4  ;;  %v2902_v29 = vadd.f32 %v2901_v41, %v2871_v49  ;;  %vm2909_vm6 = vcmask 1040384  }
 0x24c   : > { %4085 = dma.vmem_to_hbm [thread:$0]  (%p4412_p5), %s5674_s11, 2048, %s5672_s20, %s2913_s24, %s4351_s9, %s4351_s9, %s4352_s10  }
 0x24d   : > { %v2835_v42 = vadd.f32 %v2834_v48, %v2833_v9  ;;  %v2903_v21 = vrot.slane %v2902_v29, 4  ;;  %s3043_s17 = sshll.u32 %s5599_s5, 1  ;;  %s3225_s19 = sshll.u32 %s4395_s16, 5 }
 0x24e   : > { %s174_s25 = scalar_lea.vmem [#allocation4], %s3043_s17  ;;  %s5707_s24 = scalar_lea.hbm %s5753_s3, %s3225_s19 }
 0x24f   : > { %v2836_v2 = vrot.slane %v2835_v42, 2  ;;  %v2904_v38 = vadd.f32 %v2903_v21, %v2902_v29  ;;  %s2947_s26 = sshll.u32 %s174_s25, 4  ;;  %s2918_s27 = scalar_lea.sflag [#allocation5], %s5599_s5  ;;  %s5709_s26 = int_to_ptr.vmem [resolvable:$true] %s2947_s26 }
 0x250   : > { %s4282_s28 = scalar_lea.vmem %s5709_s26, 32  ;;  %s4353_s16 = smov [#allocation4]  }
 0x251   : > { %v2837_v15 = vadd.f32 %v2836_v2, %v2835_v42  ;;  %v2905_v46 = vrot.slane %v2904_v38, 2  ;;  %p4283_p1 = scmp.ne.s32.totalorder %s5709_s26, %s4282_s28  ;;  %s4286_s29 = sshll.u32 %s4353_s16, 4  ;;  %s4287_s29 = int_to_ptr.vmem [resolvable:$false] %s4286_s29 }
 0x252   : > { %s4288_s30 = scalar_lea.vmem %s4287_s29, 64  ;;  %p4289_p4 = scmp.lt.s32.totalorder %s5709_s26, %s4287_s29 }
 0x253   : > { %v2838_v20 = vrot.slane %v2837_v15, 1  ;;  %v2906_v7 = vadd.f32 %v2905_v46, %v2904_v38  ;;  %p4284_p2 = pnand %p4283_p1, %p4412_p5  ;;  %p4290_p7 = scmp.lt.s32.totalorder %s4288_s30, %s4282_s28 }
 0x255   : > { %v2907_v6 = vrot.slane %v2906_v7, 1  ;;  %v2839_v51 = vadd.f32 %v2838_v20, %v2837_v15  ;;  %p4285_p3 = pneg %p4284_p2  ;;  %p4291_p8 = por %p4290_p7, %p4289_p4 }
 0x257   : > { %v2908_v10 = vadd.f32 %v2907_v6, %v2906_v7  ;;  %p4292_p9 = pnand %p4291_p8, %p4285_p3 }
 0x259   : > { %v2910_v19 = vsel %vm2909_vm6, %v2839_v51, %v2908_v10 }
 0x25a   : > { %2911 = vst [vmem:[%s174_s25] sm:$0x3] %v2910_v19 }
 0x25b   : > { %4295 = shalt.err (!%p4292_p9)
}
 0x25c   : > { %s4296_s5 = scalar_lea.hbm %s5707_s24, 32  ;;  %s4300_s7 = scalar_lea.hbm %s5753_s3, 64 }
 0x25d   : > { %p4297_p10 = scmp.ne.s32.totalorder %s5707_s24, %s4296_s5  ;;  %p4301_p13 = scmp.lt.u32.totalorder %s5707_s24, %s5753_s3 }
 0x25e   : > { %p4302_p0 = scmp.lt.u32.totalorder %s4300_s7, %s4296_s5  ;;  %p4304_p2 = scmp.lt.u32.totalorder %s4296_s5, %s5707_s24 }
 0x25f   : > { %p4298_p11 = pnand %p4297_p10, %p4412_p5 }
 0x260   : > { %p4303_p1 = por %p4302_p0, %p4301_p13 }
 0x261   : > { %p4299_p12 = pneg %p4298_p11 }
 0x262   : > { %p4305_p3 = por %p4304_p2, %p4303_p1 }
 0x264   : > { %p4306_p4 = pnand %p4305_p3, %p4299_p12 }
 0x266   : > { %4309 = shalt.err (!%p4306_p4)
}
 0x267   : > { %4086 = dma.vmem_to_hbm [thread:$0]  (%p4412_p5), %s5709_s26, 32, %s5707_s24, %s2918_s27  }
 0x268 PF: > { %p4096_p7 = scmp.ge.s32.totalorder %s4348_s15, 2  ;;  %s2959_s10 = sand.u32 1, %s4336_s12  }
 0x269   : > { %s2960_s17 = scalar_lea.sflag [#allocation3], %s2959_s10 }
 0x26a   : > { %p4090_p8 = pnand %p4096_p7, %p4416_p6 }
 0x26c   : > { %4327 = dma.done.wait (!%p4090_p8), %s2960_s17, 2048  }
 0x26d   : > { %4329 = vsyncadd (!%p4090_p8), %s2960_s17, 4294965248  ;;  %s2969_s19 = scalar_lea.sflag [#allocation5], %s2959_s10 }
 0x26e   : > { %4331 = dma.done.wait (!%p4090_p8), %s2969_s19, 32  }
 0x26f   : > { %4333 = vsyncadd (!%p4090_p8), %s2969_s19, 4294967264  ;;  %p17_p5 = scmp.ge.s32.totalorder %s4399_s18, 4   ;;  %s5774_s12 = smov %s4340_s13 }
 0x270   : > { %s5775_s13 = smov %s4344_s14  ;;  %s5776_s14 = smov %s4410_s21 }
 0x271   : > { %s5777_s15 = smov %s4399_s18  ;;  %19 = sbr.rel (!%p17_p5) target bundleno = 5 (0x5), region = 80 }
 0x278   :  { %2974 = vsyncpa [#allocation3], 1 }
 0x279   :  { %2976 = vsyncpa [#allocation3 + $0x1], 1 }
 0x27a   :  { %2977 = vsyncpa [#allocation5], 1 }
 0x27b   :  { %2979 = vsyncpa [#allocation5 + $0x1], 1 }

</bundles_post_ra>
